<compile_context>
chip_gen: v6e
topology: v6e:2x2x1
jax: 0.10.0
libtpu: 0.0.40
codegen_flags: <defaults>
</compile_context>

<pallas_src>
import functools
import math

import jax
import jax.numpy as jnp
from jax.experimental import pallas as pl
from jax.experimental.pallas import tpu as pltpu

IN_DIM = 39
HID = 128
OUT_DIM = 1
LN_EPS = 1e-5

# Rows of the packed (8, HID) parameter slab.
_ROW_B1, _ROW_G1, _ROW_BE1 = 0, 1, 2
_ROW_B2, _ROW_G2, _ROW_BE2 = 3, 4, 5
_ROW_W3, _ROW_MISC = 6, 7
# Lanes of the misc row.
_MISC_B3, _MISC_B1SUM, _MISC_B2SUM = 0, 1, 2


def _round_up(v, m):
    return ((v + m - 1) // m) * m


def _layernorm_with_mean(h, mean, gamma, beta):
    # Centered (torch-like, biased-variance) LayerNorm; mean is supplied from
    # the extra MXU column, so only one cross-lane reduce remains here.
    centered = h - mean
    var = jnp.mean(centered * centered, axis=-1, keepdims=True)
    inv = jax.lax.rsqrt(var + LN_EPS)
    return centered * inv * gamma + beta


def mlp_kernel(x_ref, w1_ref, w2_ref, p_ref, o_ref, *, sub, num_sub):
    # Hoist all parameters out of the sub-chunk loop (loaded once per step).
    w1 = w1_ref[...]                      # (IN_DIM, HID+1), matmul dtype
    w2 = w2_ref[...]                      # (HID,    HID+1), matmul dtype
    pv = p_ref[...]                       # (8, HID) f32 packed param slab
    b1, g1, be1 = pv[_ROW_B1:_ROW_B1 + 1, :], pv[_ROW_G1:_ROW_G1 + 1, :], pv[_ROW_BE1:_ROW_BE1 + 1, :]
    b2, g2, be2 = pv[_ROW_B2:_ROW_B2 + 1, :], pv[_ROW_G2:_ROW_G2 + 1, :], pv[_ROW_BE2:_ROW_BE2 + 1, :]
    w3 = pv[_ROW_W3:_ROW_W3 + 1, :]       # (1, HID) fc3 weights, f32
    misc = pv[_ROW_MISC:_ROW_MISC + 1, :]
    b3 = misc[:, _MISC_B3:_MISC_B3 + 1]           # (1, 1)
    b1_sum = misc[:, _MISC_B1SUM:_MISC_B1SUM + 1]  # (1, 1)
    b2_sum = misc[:, _MISC_B2SUM:_MISC_B2SUM + 1]  # (1, 1)
    inv_hid = 1.0 / HID

    def process(off):
        x = x_ref[pl.ds(off, sub), :]
        xm = x if x.dtype == w1.dtype else x.astype(w1.dtype)

        # fc1 (+ folded row-sum column) -> LayerNorm -> ReLU.  f32 accumulate.
        h_ext = jnp.dot(xm, w1, preferred_element_type=jnp.float32)
        h = h_ext[:, :HID] + b1
        mean = (h_ext[:, HID:HID + 1] + b1_sum) * inv_hid   # mean from MXU col
        h = _layernorm_with_mean(h, mean, g1, be1)
        h = jnp.maximum(h, 0.0)

        # fc2 (+ folded row-sum column) -> LayerNorm -> ReLU.
        h_ext = jnp.dot(h.astype(w2.dtype), w2,
                        preferred_element_type=jnp.float32)
        h = h_ext[:, :HID] + b2
        mean = (h_ext[:, HID:HID + 1] + b2_sum) * inv_hid
        h = _layernorm_with_mean(h, mean, g2, be2)
        h = jnp.maximum(h, 0.0)

        # fc3 on the MXU, contracting the lane (feature) axis so the result
        # lands lane-major as (1, sub) -> unmasked lane-dense stores.
        y = jax.lax.dot_general(
            w3, h, (((1,), (1,)), ((), ())),
            preferred_element_type=jnp.float32) + b3
        o_ref[:, pl.ds(off, sub)] = y.astype(o_ref.dtype)

    if num_sub == 1:
        process(0)
    else:
        unroll = num_sub if num_sub <= 4 else 4   # cap unroll: bound vreg pressure

        def body(s, carry):
            process(pl.multiple_of(s * sub, sub))
            return carry

        jax.lax.fori_loop(0, num_sub, body, 0, unroll=unroll)


def popoola_mlp_forward(x, params, *, batch_tile=None, sub_tile=128,
                        use_bf16_matmul=True):
    B, F = x.shape
    assert F == IN_DIM
    (w1, b1, g1, be1, w2, b2, g2, be2, w3, b3) = params

    # ---- batch tiling -------------------------------------------------------
    if batch_tile is None:
        # Large blocks amortize the ~0.35us/grid-step overhead; aim for >= 2
        # grid steps so the "parallel" axis can shard across v7x's two TCs
        # (and keeps the DMA pipeline fed on v5e/v6e).  VMEM is not a
        # constraint even at 8192 rows (~2-3 MiB total).
        batch_tile = int(max(128, min(8192, _round_up(int(pl.cdiv(B, 2)), 128))))
    assert batch_tile % 8 == 0, "batch_tile must be a multiple of 8 sublanes"
    num_tiles = int(pl.cdiv(B, batch_tile))
    b_pad = num_tiles * batch_tile
    if b_pad != B:
        # Padded rows are computed on zeros (finite everywhere) and sliced off.
        x = jnp.pad(x, ((0, b_pad - B), (0, 0)))

    # Sub-chunk the block inside the kernel to bound live f32 intermediates.
    if batch_tile % sub_tile == 0 and batch_tile > sub_tile:
        sub = sub_tile
    else:
        sub = batch_tile
    num_sub = batch_tile // sub

    # ---- parameter packing --------------------------------------------------
    mm_dtype = jnp.bfloat16 if use_bf16_matmul else jnp.float32
    # Extra column = per-row weight sums, so sum_j h[:, j] falls out of the
    # matmul (mean offloaded to the half-idle MXU on v6e/v7x).
    w1_ext = jnp.concatenate(
        [w1, jnp.sum(w1, axis=1, keepdims=True)], axis=1).astype(mm_dtype)
    w2_ext = jnp.concatenate(
        [w2, jnp.sum(w2, axis=1, keepdims=True)], axis=1).astype(mm_dtype)

    misc = jnp.zeros((1, HID), jnp.float32)
    misc = misc.at[0, _MISC_B3].set(b3[0, 0])
    misc = misc.at[0, _MISC_B1SUM].set(jnp.sum(b1))
    misc = misc.at[0, _MISC_B2SUM].set(jnp.sum(b2))
    pslab = jnp.concatenate(
        [b1, g1, be1, b2, g2, be2, w3.reshape(1, HID), misc],
        axis=0).astype(jnp.float32)                       # (8, HID)

    # ---- pallas_call --------------------------------------------------------
    def _const_spec(shape):
        # Full-array block, constant block index: stays resident in VMEM.
        return pl.BlockSpec(shape, lambda i: tuple(0 for _ in shape))

    in_specs = [
        pl.BlockSpec((batch_tile, IN_DIM), lambda i: (i, 0)),   # x
        _const_spec(w1_ext.shape),
        _const_spec(w2_ext.shape),
        _const_spec(pslab.shape),
    ]
    # Lane-dense output: one row of b_pad lanes, blocked along lanes.
    out_spec = pl.BlockSpec((1, batch_tile), lambda i: (0, i))

    kernel = functools.partial(mlp_kernel, sub=sub, num_sub=num_sub)

    out = pl.pallas_call(
        kernel,
        out_shape=jax.ShapeDtypeStruct((1, b_pad), x.dtype),
        grid_spec=pltpu.PrefetchScalarGridSpec(
            num_scalar_prefetch=0,
            grid=(num_tiles,),
            in_specs=in_specs,
            out_specs=out_spec,
        ),
        compiler_params=pltpu.CompilerParams(
            # Batch tiles are independent -> shards across v7x's 2 TCs.
            dimension_semantics=("parallel",)),
    )(x, w1_ext, w2_ext, pslab)

    return out.reshape(b_pad, OUT_DIM)[:B]


def init_params(key):
    """Deterministic init mirroring the torch module's shapes.

    Linear weights: xavier_uniform; linear biases: U(-1/sqrt(fan_in), +).
    LayerNorm: gamma=1, beta=0. Weights stored as (in, out)."""
    k1, k2, k3, kb1, kb2, kb3 = jax.random.split(key, 6)

    def xavier(k, fan_in, fan_out):
        bound = math.sqrt(6.0 / (fan_in + fan_out))
        return jax.random.uniform(k, (fan_in, fan_out), jnp.float32,
                                  minval=-bound, maxval=bound)

    def bias(k, fan_in, fan_out):
        bound = 1.0 / math.sqrt(fan_in)
        return jax.random.uniform(k, (1, fan_out), jnp.float32,
                                  minval=-bound, maxval=bound)

    w1 = xavier(k1, IN_DIM, HID)
    b1 = bias(kb1, IN_DIM, HID)
    g1 = jnp.ones((1, HID), jnp.float32)
    be1 = jnp.zeros((1, HID), jnp.float32)

    w2 = xavier(k2, HID, HID)
    b2 = bias(kb2, HID, HID)
    g2 = jnp.ones((1, HID), jnp.float32)
    be2 = jnp.zeros((1, HID), jnp.float32)

    w3 = xavier(k3, HID, OUT_DIM)
    b3 = bias(kb3, HID, OUT_DIM)

    return (w1, b1, g1, be1, w2, b2, g2, be2, w3, b3)


def reference_forward(x, params, *, use_bf16_matmul=True, fold_mean=True):
    """Pure-JAX reference. fold_mean/use_bf16_matmul mirror the kernel's
    precision decisions; (False, False) is plain torch-semantics f32."""
    (w1, b1, g1, be1, w2, b2, g2, be2, w3, b3) = params
    mm = jnp.bfloat16 if use_bf16_matmul else jnp.float32

    def layer(xin, w, b, g, be):
        xm = xin.astype(mm)
        h = jnp.dot(xm, w.astype(mm), preferred_element_type=jnp.float32) + b
        if fold_mean:
            ws = jnp.sum(w, axis=1, keepdims=True).astype(mm)
            s = jnp.dot(xm, ws, preferred_element_type=jnp.float32) + jnp.sum(b)
            mean = s * (1.0 / HID)
        else:
            mean = jnp.mean(h, axis=-1, keepdims=True)
        centered = h - mean
        var = jnp.mean(centered * centered, axis=-1, keepdims=True)
        hn = centered * jax.lax.rsqrt(var + LN_EPS) * g + be
        return jnp.maximum(hn, 0.0)

    h = layer(x, w1, b1, g1, be1)
    h = layer(h, w2, b2, g2, be2)
    return h @ w3 + b3


if __name__ == "__main__":
    key = jax.random.PRNGKey(0)
    kx, kp = jax.random.split(key)

    # B deliberately not a power of two / tile multiple: auto-tiling picks
    # batch_tile=256 -> 2 grid steps, 212 padded rows, 2 sub-chunks of 128.
    B = 300
    x = jax.random.normal(kx, (B, IN_DIM), jnp.float32)
    params = init_params(kp)

    out = popoola_mlp_forward(x, params, use_bf16_matmul=True)
    out = jax.block_until_ready(out)
    assert out.shape == (B, OUT_DIM)

    # Precision-mirrored reference (same bf16 operands, f32 accum, folded mean).
    ref = reference_forward(x, params, use_bf16_matmul=True, fold_mean=True)
    assert jnp.allclose(out, ref, atol=2e-3, rtol=2e-3), \
        "mismatch vs precision-mirrored reference"

    # Loose sanity check vs the torch-semantics pure-f32 reference.
    ref_f32 = reference_forward(x, params, use_bf16_matmul=False, fold_mean=False)
    assert jnp.allclose(out, ref_f32, atol=1e-1, rtol=1e-1), \
        "gross mismatch vs f32 reference"

    print("KERNEL_OK")
</pallas_src>

<mosaic_0001>
module attributes {stable_mosaic.version = 11 : i64} {
  func.func @mlp_kernel(%arg0: i32, %arg1: memref<256x39xf32, #tpu.memory_space<vmem>>, %arg2: memref<39x129xbf16, #tpu.memory_space<vmem>>, %arg3: memref<128x129xbf16, #tpu.memory_space<vmem>>, %arg4: memref<8x128xf32, #tpu.memory_space<vmem>>, %arg5: memref<1x256xf32, #tpu.memory_space<vmem>>) attributes {dimension_semantics = [#tpu.dimension_semantics<parallel>], iteration_bounds = array<i64: 2>, scalar_prefetch = 0 : i64, scratch_operands = 0 : i64, tpu.core_type = #tpu.core_type<tc>, window_params = [{transform_indices = @transform_0, window_bounds = array<i64: 256, 39>}, {pipeline_mode = #tpu.pipeline_mode<synchronous>, transform_indices = @transform_1, window_bounds = array<i64: 39, 129>}, {pipeline_mode = #tpu.pipeline_mode<synchronous>, transform_indices = @transform_2, window_bounds = array<i64: 128, 129>}, {pipeline_mode = #tpu.pipeline_mode<synchronous>, transform_indices = @transform_3, window_bounds = array<i64: 8, 128>}, {transform_indices = @transform_4, window_bounds = array<i64: 1, 256>}]} {
    %c0 = arith.constant 0 : index
    %c0_0 = arith.constant 0 : index
    %0 = vector.load %arg2[%c0, %c0_0] : memref<39x129xbf16, #tpu.memory_space<vmem>>, vector<39x129xbf16>
    %c0_1 = arith.constant 0 : index
    %c0_2 = arith.constant 0 : index
    %1 = vector.load %arg3[%c0_1, %c0_2] : memref<128x129xbf16, #tpu.memory_space<vmem>>, vector<128x129xbf16>
    %c0_3 = arith.constant 0 : index
    %c0_4 = arith.constant 0 : index
    %2 = vector.load %arg4[%c0_3, %c0_4] : memref<8x128xf32, #tpu.memory_space<vmem>>, vector<8x128xf32>
    %3 = vector.extract_strided_slice %2 {offsets = [0, 0], sizes = [1, 128], strides = [1, 1]} : vector<8x128xf32> to vector<1x128xf32>
    %4 = vector.extract_strided_slice %2 {offsets = [1, 0], sizes = [1, 128], strides = [1, 1]} : vector<8x128xf32> to vector<1x128xf32>
    %5 = vector.extract_strided_slice %2 {offsets = [2, 0], sizes = [1, 128], strides = [1, 1]} : vector<8x128xf32> to vector<1x128xf32>
    %6 = vector.extract_strided_slice %2 {offsets = [3, 0], sizes = [1, 128], strides = [1, 1]} : vector<8x128xf32> to vector<1x128xf32>
    %7 = vector.extract_strided_slice %2 {offsets = [4, 0], sizes = [1, 128], strides = [1, 1]} : vector<8x128xf32> to vector<1x128xf32>
    %8 = vector.extract_strided_slice %2 {offsets = [5, 0], sizes = [1, 128], strides = [1, 1]} : vector<8x128xf32> to vector<1x128xf32>
    %9 = vector.extract_strided_slice %2 {offsets = [6, 0], sizes = [1, 128], strides = [1, 1]} : vector<8x128xf32> to vector<1x128xf32>
    %10 = vector.extract_strided_slice %2 {offsets = [7, 0], sizes = [1, 128], strides = [1, 1]} : vector<8x128xf32> to vector<1x128xf32>
    %11 = vector.extract_strided_slice %10 {offsets = [0, 0], sizes = [1, 1], strides = [1, 1]} : vector<1x128xf32> to vector<1x1xf32>
    %12 = vector.extract_strided_slice %10 {offsets = [0, 1], sizes = [1, 1], strides = [1, 1]} : vector<1x128xf32> to vector<1x1xf32>
    %13 = vector.extract_strided_slice %10 {offsets = [0, 2], sizes = [1, 1], strides = [1, 1]} : vector<1x128xf32> to vector<1x1xf32>
    %c0_i32 = arith.constant 0 : i32
    %c128_i32 = arith.constant 128 : i32
    %14 = arith.muli %c0_i32, %c128_i32 : i32
    %15 = tpu.assume_multiple %14, 128 : i32
    %16 = arith.index_cast %15 : i32 to index
    %c0_5 = arith.constant 0 : index
    %17 = vector.load %arg1[%16, %c0_5] : memref<256x39xf32, #tpu.memory_space<vmem>>, vector<128x39xf32>
    %18 = arith.truncf %17 : vector<128x39xf32> to vector<128x39xbf16>
    %cst = arith.constant dense<0.000000e+00> : vector<128x129xf32>
    %19 = tpu.matmul %18, %0, %cst {dimension_numbers = #tpu.dot_dimension_numbers<[1], [0], [0], [1], [0, 0, 1, 1], [], []>} : vector<128x39xbf16>, vector<39x129xbf16>, vector<128x129xf32> -> vector<128x129xf32>
    %20 = vector.extract_strided_slice %19 {offsets = [0, 0], sizes = [128, 128], strides = [1, 1]} : vector<128x129xf32> to vector<128x128xf32>
    %21 = vector.broadcast %3 : vector<1x128xf32> to vector<128x128xf32>
    %22 = arith.addf %20, %21 : vector<128x128xf32>
    %23 = vector.extract_strided_slice %19 {offsets = [0, 128], sizes = [128, 1], strides = [1, 1]} : vector<128x129xf32> to vector<128x1xf32>
    %24 = vector.broadcast %12 : vector<1x1xf32> to vector<128x1xf32>
    %25 = arith.addf %23, %24 : vector<128x1xf32>
    %cst_6 = arith.constant 7.812500e-03 : f32
    %26 = vector.broadcast %cst_6 : f32 to vector<128x1xf32>
    %27 = arith.mulf %25, %26 : vector<128x1xf32>
    %28 = vector.broadcast %27 : vector<128x1xf32> to vector<128x128xf32>
    %29 = arith.subf %22, %28 : vector<128x128xf32>
    %30 = arith.mulf %29, %29 : vector<128x128xf32>
    %cst_7 = arith.constant dense<0.000000e+00> : vector<128xf32>
    %31 = vector.multi_reduction <add>, %30, %cst_7 [1] : vector<128x128xf32> to vector<128xf32>
    %32 = vector.shape_cast %31 : vector<128xf32> to vector<128x1xf32>
    %cst_8 = arith.constant 1.280000e+02 : f32
    %33 = vector.broadcast %cst_8 : f32 to vector<128x1xf32>
    %34 = arith.divf %32, %33 : vector<128x1xf32>
    %cst_9 = arith.constant 9.99999974E-6 : f32
    %35 = vector.broadcast %cst_9 : f32 to vector<128x1xf32>
    %36 = arith.addf %34, %35 : vector<128x1xf32>
    %37 = math.rsqrt %36 : vector<128x1xf32>
    %38 = vector.broadcast %37 : vector<128x1xf32> to vector<128x128xf32>
    %39 = arith.mulf %29, %38 : vector<128x128xf32>
    %40 = vector.broadcast %4 : vector<1x128xf32> to vector<128x128xf32>
    %41 = arith.mulf %39, %40 : vector<128x128xf32>
    %42 = vector.broadcast %5 : vector<1x128xf32> to vector<128x128xf32>
    %43 = arith.addf %41, %42 : vector<128x128xf32>
    %cst_10 = arith.constant 0.000000e+00 : f32
    %44 = vector.broadcast %cst_10 : f32 to vector<128x128xf32>
    %45 = arith.maximumf %43, %44 : vector<128x128xf32>
    %46 = arith.truncf %45 : vector<128x128xf32> to vector<128x128xbf16>
    %cst_11 = arith.constant dense<0.000000e+00> : vector<128x129xf32>
    %47 = tpu.matmul %46, %1, %cst_11 {dimension_numbers = #tpu.dot_dimension_numbers<[1], [0], [0], [1], [0, 0, 1, 1], [], []>} : vector<128x128xbf16>, vector<128x129xbf16>, vector<128x129xf32> -> vector<128x129xf32>
    %48 = vector.extract_strided_slice %47 {offsets = [0, 0], sizes = [128, 128], strides = [1, 1]} : vector<128x129xf32> to vector<128x128xf32>
    %49 = vector.broadcast %6 : vector<1x128xf32> to vector<128x128xf32>
    %50 = arith.addf %48, %49 : vector<128x128xf32>
    %51 = vector.extract_strided_slice %47 {offsets = [0, 128], sizes = [128, 1], strides = [1, 1]} : vector<128x129xf32> to vector<128x1xf32>
    %52 = vector.broadcast %13 : vector<1x1xf32> to vector<128x1xf32>
    %53 = arith.addf %51, %52 : vector<128x1xf32>
    %cst_12 = arith.constant 7.812500e-03 : f32
    %54 = vector.broadcast %cst_12 : f32 to vector<128x1xf32>
    %55 = arith.mulf %53, %54 : vector<128x1xf32>
    %56 = vector.broadcast %55 : vector<128x1xf32> to vector<128x128xf32>
    %57 = arith.subf %50, %56 : vector<128x128xf32>
    %58 = arith.mulf %57, %57 : vector<128x128xf32>
    %cst_13 = arith.constant dense<0.000000e+00> : vector<128xf32>
    %59 = vector.multi_reduction <add>, %58, %cst_13 [1] : vector<128x128xf32> to vector<128xf32>
    %60 = vector.shape_cast %59 : vector<128xf32> to vector<128x1xf32>
    %cst_14 = arith.constant 1.280000e+02 : f32
    %61 = vector.broadcast %cst_14 : f32 to vector<128x1xf32>
    %62 = arith.divf %60, %61 : vector<128x1xf32>
    %cst_15 = arith.constant 9.99999974E-6 : f32
    %63 = vector.broadcast %cst_15 : f32 to vector<128x1xf32>
    %64 = arith.addf %62, %63 : vector<128x1xf32>
    %65 = math.rsqrt %64 : vector<128x1xf32>
    %66 = vector.broadcast %65 : vector<128x1xf32> to vector<128x128xf32>
    %67 = arith.mulf %57, %66 : vector<128x128xf32>
    %68 = vector.broadcast %7 : vector<1x128xf32> to vector<128x128xf32>
    %69 = arith.mulf %67, %68 : vector<128x128xf32>
    %70 = vector.broadcast %8 : vector<1x128xf32> to vector<128x128xf32>
    %71 = arith.addf %69, %70 : vector<128x128xf32>
    %cst_16 = arith.constant 0.000000e+00 : f32
    %72 = vector.broadcast %cst_16 : f32 to vector<128x128xf32>
    %73 = arith.maximumf %71, %72 : vector<128x128xf32>
    %cst_17 = arith.constant dense<0.000000e+00> : vector<1x128xf32>
    %74 = tpu.matmul %9, %73, %cst_17 {dimension_numbers = #tpu.dot_dimension_numbers<[1], [1], [0], [0], [0, 0, 1, 0], [], []>} : vector<1x128xf32>, vector<128x128xf32>, vector<1x128xf32> -> vector<1x128xf32>
    %75 = vector.broadcast %11 : vector<1x1xf32> to vector<1x128xf32>
    %76 = arith.addf %74, %75 : vector<1x128xf32>
    %c0_18 = arith.constant 0 : index
    %77 = arith.index_cast %15 : i32 to index
    %78 = vector.load %arg5[%c0_18, %77] : memref<1x256xf32, #tpu.memory_space<vmem>>, vector<1x128xf32>
    tpu.vector_store %arg5[%c0_18, %77], %76 {strides = array<i32>} : memref<1x256xf32, #tpu.memory_space<vmem>>, vector<1x128xf32>,
    %c1_i32 = arith.constant 1 : i32
    %c128_i32_19 = arith.constant 128 : i32
    %79 = arith.muli %c1_i32, %c128_i32_19 : i32
    %80 = tpu.assume_multiple %79, 128 : i32
    %81 = arith.index_cast %80 : i32 to index
    %c0_20 = arith.constant 0 : index
    %82 = vector.load %arg1[%81, %c0_20] : memref<256x39xf32, #tpu.memory_space<vmem>>, vector<128x39xf32>
    %83 = arith.truncf %82 : vector<128x39xf32> to vector<128x39xbf16>
    %cst_21 = arith.constant dense<0.000000e+00> : vector<128x129xf32>
    %84 = tpu.matmul %83, %0, %cst_21 {dimension_numbers = #tpu.dot_dimension_numbers<[1], [0], [0], [1], [0, 0, 1, 1], [], []>} : vector<128x39xbf16>, vector<39x129xbf16>, vector<128x129xf32> -> vector<128x129xf32>
    %85 = vector.extract_strided_slice %84 {offsets = [0, 0], sizes = [128, 128], strides = [1, 1]} : vector<128x129xf32> to vector<128x128xf32>
    %86 = vector.broadcast %3 : vector<1x128xf32> to vector<128x128xf32>
    %87 = arith.addf %85, %86 : vector<128x128xf32>
    %88 = vector.extract_strided_slice %84 {offsets = [0, 128], sizes = [128, 1], strides = [1, 1]} : vector<128x129xf32> to vector<128x1xf32>
    %89 = vector.broadcast %12 : vector<1x1xf32> to vector<128x1xf32>
    %90 = arith.addf %88, %89 : vector<128x1xf32>
    %cst_22 = arith.constant 7.812500e-03 : f32
    %91 = vector.broadcast %cst_22 : f32 to vector<128x1xf32>
    %92 = arith.mulf %90, %91 : vector<128x1xf32>
    %93 = vector.broadcast %92 : vector<128x1xf32> to vector<128x128xf32>
    %94 = arith.subf %87, %93 : vector<128x128xf32>
    %95 = arith.mulf %94, %94 : vector<128x128xf32>
    %cst_23 = arith.constant dense<0.000000e+00> : vector<128xf32>
    %96 = vector.multi_reduction <add>, %95, %cst_23 [1] : vector<128x128xf32> to vector<128xf32>
    %97 = vector.shape_cast %96 : vector<128xf32> to vector<128x1xf32>
    %cst_24 = arith.constant 1.280000e+02 : f32
    %98 = vector.broadcast %cst_24 : f32 to vector<128x1xf32>
    %99 = arith.divf %97, %98 : vector<128x1xf32>
    %cst_25 = arith.constant 9.99999974E-6 : f32
    %100 = vector.broadcast %cst_25 : f32 to vector<128x1xf32>
    %101 = arith.addf %99, %100 : vector<128x1xf32>
    %102 = math.rsqrt %101 : vector<128x1xf32>
    %103 = vector.broadcast %102 : vector<128x1xf32> to vector<128x128xf32>
    %104 = arith.mulf %94, %103 : vector<128x128xf32>
    %105 = vector.broadcast %4 : vector<1x128xf32> to vector<128x128xf32>
    %106 = arith.mulf %104, %105 : vector<128x128xf32>
    %107 = vector.broadcast %5 : vector<1x128xf32> to vector<128x128xf32>
    %108 = arith.addf %106, %107 : vector<128x128xf32>
    %cst_26 = arith.constant 0.000000e+00 : f32
    %109 = vector.broadcast %cst_26 : f32 to vector<128x128xf32>
    %110 = arith.maximumf %108, %109 : vector<128x128xf32>
    %111 = arith.truncf %110 : vector<128x128xf32> to vector<128x128xbf16>
    %cst_27 = arith.constant dense<0.000000e+00> : vector<128x129xf32>
    %112 = tpu.matmul %111, %1, %cst_27 {dimension_numbers = #tpu.dot_dimension_numbers<[1], [0], [0], [1], [0, 0, 1, 1], [], []>} : vector<128x128xbf16>, vector<128x129xbf16>, vector<128x129xf32> -> vector<128x129xf32>
    %113 = vector.extract_strided_slice %112 {offsets = [0, 0], sizes = [128, 128], strides = [1, 1]} : vector<128x129xf32> to vector<128x128xf32>
    %114 = vector.broadcast %6 : vector<1x128xf32> to vector<128x128xf32>
    %115 = arith.addf %113, %114 : vector<128x128xf32>
    %116 = vector.extract_strided_slice %112 {offsets = [0, 128], sizes = [128, 1], strides = [1, 1]} : vector<128x129xf32> to vector<128x1xf32>
    %117 = vector.broadcast %13 : vector<1x1xf32> to vector<128x1xf32>
    %118 = arith.addf %116, %117 : vector<128x1xf32>
    %cst_28 = arith.constant 7.812500e-03 : f32
    %119 = vector.broadcast %cst_28 : f32 to vector<128x1xf32>
    %120 = arith.mulf %118, %119 : vector<128x1xf32>
    %121 = vector.broadcast %120 : vector<128x1xf32> to vector<128x128xf32>
    %122 = arith.subf %115, %121 : vector<128x128xf32>
    %123 = arith.mulf %122, %122 : vector<128x128xf32>
    %cst_29 = arith.constant dense<0.000000e+00> : vector<128xf32>
    %124 = vector.multi_reduction <add>, %123, %cst_29 [1] : vector<128x128xf32> to vector<128xf32>
    %125 = vector.shape_cast %124 : vector<128xf32> to vector<128x1xf32>
    %cst_30 = arith.constant 1.280000e+02 : f32
    %126 = vector.broadcast %cst_30 : f32 to vector<128x1xf32>
    %127 = arith.divf %125, %126 : vector<128x1xf32>
    %cst_31 = arith.constant 9.99999974E-6 : f32
    %128 = vector.broadcast %cst_31 : f32 to vector<128x1xf32>
    %129 = arith.addf %127, %128 : vector<128x1xf32>
    %130 = math.rsqrt %129 : vector<128x1xf32>
    %131 = vector.broadcast %130 : vector<128x1xf32> to vector<128x128xf32>
    %132 = arith.mulf %122, %131 : vector<128x128xf32>
    %133 = vector.broadcast %7 : vector<1x128xf32> to vector<128x128xf32>
    %134 = arith.mulf %132, %133 : vector<128x128xf32>
    %135 = vector.broadcast %8 : vector<1x128xf32> to vector<128x128xf32>
    %136 = arith.addf %134, %135 : vector<128x128xf32>
    %cst_32 = arith.constant 0.000000e+00 : f32
    %137 = vector.broadcast %cst_32 : f32 to vector<128x128xf32>
    %138 = arith.maximumf %136, %137 : vector<128x128xf32>
    %cst_33 = arith.constant dense<0.000000e+00> : vector<1x128xf32>
    %139 = tpu.matmul %9, %138, %cst_33 {dimension_numbers = #tpu.dot_dimension_numbers<[1], [1], [0], [0], [0, 0, 1, 0], [], []>} : vector<1x128xf32>, vector<128x128xf32>, vector<1x128xf32> -> vector<1x128xf32>
    %140 = vector.broadcast %11 : vector<1x1xf32> to vector<1x128xf32>
    %141 = arith.addf %139, %140 : vector<1x128xf32>
    %c0_34 = arith.constant 0 : index
    %142 = arith.index_cast %80 : i32 to index
    %143 = vector.load %arg5[%c0_34, %142] : memref<1x256xf32, #tpu.memory_space<vmem>>, vector<1x128xf32>
    tpu.vector_store %arg5[%c0_34, %142], %141 {strides = array<i32>} : memref<1x256xf32, #tpu.memory_space<vmem>>, vector<1x128xf32>,
    %c2_i32 = arith.constant 2 : i32
    return
  }
  func.func @transform_0(%arg0: i32) -> (i32, i32) {
    %c0_i32 = arith.constant 0 : i32
    %c0_i32_0 = arith.constant 0 : i32
    return %arg0, %c0_i32 : i32, i32
  }
  func.func @transform_1(%arg0: i32) -> (i32, i32) {
    %c0_i32 = arith.constant 0 : i32
    %c0_i32_0 = arith.constant 0 : i32
    %c0_i32_1 = arith.constant 0 : i32
    return %c0_i32, %c0_i32_0 : i32, i32
  }
  func.func @transform_2(%arg0: i32) -> (i32, i32) {
    %c0_i32 = arith.constant 0 : i32
    %c0_i32_0 = arith.constant 0 : i32
    %c0_i32_1 = arith.constant 0 : i32
    return %c0_i32, %c0_i32_0 : i32, i32
  }
  func.func @transform_3(%arg0: i32) -> (i32, i32) {
    %c0_i32 = arith.constant 0 : i32
    %c0_i32_0 = arith.constant 0 : i32
    %c0_i32_1 = arith.constant 0 : i32
    return %c0_i32, %c0_i32_0 : i32, i32
  }
  func.func @transform_4(%arg0: i32) -> (i32, i32) {
    %c0_i32 = arith.constant 0 : i32
    %c0_i32_0 = arith.constant 0 : i32
    return %c0_i32, %arg0 : i32, i32
  }
}

</mosaic_0001>

<bundles_post_ra>
// kernel: tpu_custom_call.1
= control target key start
LH: loop header
LB: loop body
LE: loop exit
PB: predicated region body
PF: predicated region fallthrough
CT: control target
= control target key end

     0   :  { %9 = vsyncpa [#allocation3], 0  ;;  %s4073_s0 = inlined_call_operand.vmem [shape: f32[512,39], index: 0, kind: input, shape index: {}]   ;;  %s4074_s1 = inlined_call_operand.vmem [shape: bf16[39,129], index: 1, kind: input, shape index: {}]   ;;  %s4075_s2 = inlined_call_operand.vmem [shape: bf16[128,129], index: 2, kind: input, shape index: {}]   ;;  %s4076_s3 = inlined_call_operand.vmem [shape: f32[8,128], index: 3, kind: input, shape index: {}]   ;;  %s4077_s4 = inlined_call_operand.hbm [shape: f32[1,512], index: 4, kind: output, shape index: {}]  }
   0x1   :  { %11 = vsyncpa [#allocation3 + $0x1], 0  ;;  %s2863_s15 = smov 0   ;;  %s2865_s16 = smov 0  }
   0x2   :  { %s2867_s17 = smov 0   ;;  %s2869_s18 = smov 0  }
   0x3 LB: > { %s2383_s19 = sadd.s32 4294967295, %s2829_s18   ;;  %s2384_s20 = sadd.s32 4294967294, %s2829_s18   ;;  %s2829_s18 = sphi %s2869_s18, %s4085_s18   ;;  %s2825_s17 = sphi %s2867_s17, %s4084_s17   ;;  %s2821_s16 = sphi %s2865_s16, %s4083_s16   ;;  %s2817_s15 = sphi %s2863_s15, %s4082_s15  }
   0x4   : > { %s2886_s21 = sadd.s32 1, %s2829_s18   ;;  %s113_s22 = sadd.s32 1, %s2825_s17 }
   0x5   : > { %s110_s23 = ssub.s32 %s2829_s18, %s2886_s21  ;;  %p123_p0 = scmp.ne.s32.totalorder %s2825_s17, %s2821_s16 }
   0x6   : > { %p111_p1 = scmp.eq.s32.totalorder %s110_s23, 0  ;;  %p124_p2 = scmp.eq.s32.totalorder %s2383_s19, 1 }
   0x7   : > { %p129_p3 = scmp.ne.s32.totalorder %s2821_s16, %s2817_s15  ;;  %p130_p4 = scmp.eq.s32.totalorder %s2384_s20, 1 }
   0x8   : > { %s2896_s24 = scalar_select %p111_p1, %s2825_s17, %s113_s22  }
   0x9   : > { %p2898_p5 = por %p124_p2, %p123_p0  ;;  %p2902_p6 = por %p130_p4, %p129_p3 }
   0xa   : > { %p2387_p7 = scmp.ge.s32.totalorder %s2829_s18, 1  ;;  %p166_p8 = scmp.lt.s32.totalorder %s2829_s18, 3 }
   0xc   : > { %p167_p9 = pnand %p2387_p7, %p166_p8 }
   0xd   : > { %s2918_s5 = sshll.u32 (!%p167_p9), %s2383_s19, 5  ;;  %s2833_s27 = smov (!%p167_p9), 127  }
   0xe   : > { %170 = sbr.rel (%p167_p9) target bundleno = 2478 (0x9ae), region = 36  ;;  %p193_p10 = scmp.lt.s32.totalorder (!%p167_p9), %s2918_s5, 63 }
   0xf   : > { %s2834_s28 = smov (!%p167_p9), 126   ;;  %s189_s19 = sand.u32 (!%p167_p9), 1, %s2821_s16  }
  0x10   : > { %s2388_s22 = sshll.u32 (!%p167_p9), %s189_s19, 1  ;;  %s4033_s30 = scalar_lea.hbm (!%p167_p9), %s4077_s4, %s2918_s5 }
  0x11   : > { %s3977_s23 = scalar_lea.vmem (!%p167_p9), [#allocation2], %s2388_s22  ;;  %s2311_s6 = scalar_lea.sflag (!%p167_p9), [#allocation3], %s189_s19 }
  0x12   : > { %s2837_s8 = smov (!%p167_p9), [#allocation2]  }
  0x13   : > { %v204_v0 = vld [vmem:[%s4074_s1 + $0x20] sm:$0xff]  ;;  %vm296_vm0 = vcmask 1042432   ;;  %vm297_vm1 = vcmask 1043456   ;;  %v419_v1 = vlaneseq  ;;  %v2831_v3 = vmov 65535   ;;  %v2605_v9 = vld [vmem:[%s4074_s1 + $0x14] ss:$8 sps:$4 sm:$0xff]  }
  0x14   : > { %v2396_v2 = vcombine.high %v204_v0, %v204_v0  ;;  %v298_v4 = vsel %vm296_vm0, 4294967295, %v2831_v3  ;;  %v2395_v5 = vcombine.low %v204_v0, %v204_v0  ;;  %v2923_v10 = vld [vmem:[%s4076_s3] sm:$0xff]  ;;  %v2607_v11 = vld [vmem:[%s4074_s1 + $0x10] ss:$8 sps:$4 sm:$0xff]   ;;  %v2832_v12 = vmov 0   ;;  %s194_s12 = scalar_select %p193_p10, %s2918_s5, 63 }
  0x15   : > { %v299_v6 = vsel %vm297_vm1, %v298_v4, 0  ;;  %338 = vmatprep.mubr.bf16.mxu0 %v2832_v12  ;;  %v2931_v13 = vshrl.u32 %v419_v1, 7  ;;  %2601 = vset.pattern.permute.xlu0 %v2832_v12  ;;  %v2608_v14 = vld [vmem:[%s4074_s1 + $0x4] ss:$8 sps:$4 sm:$0xff]   ;;  %v2610_v17 = vld [vmem:[%s4074_s1] ss:$8 sps:$4 sm:$0xff]  }
  0x16   : > { %v2911_v7 = vand.u32 %v2396_v2, %v299_v6  ;;  %v2913_v8 = vand.u32 %v2395_v5, %v299_v6  ;;  %2602 = vset.pattern.permute.xlu1 %v2832_v12  ;;  %864 = vmatprep.mubr.bf16.mxu1 %v2832_v12  ;;  %s2390_s13 = sshll.u32 %s194_s12, 3  ;;  %vm271_vm2 = vcmask 318464   ;;  %vm2836_vm3 = vmmov 0   ;;  %s2773_s9 = sshll.u32 %s2837_s8, 4  ;;  %s2774_s9 = int_to_ptr.vmem [resolvable:$false] %s2773_s9 }
  0x17   : > { %v441_v15 = vsub.s32 7, %v2931_v13  ;;  %s2949_s20 = scalar_lea.vmem %s4073_s0, %s2390_s13  ;;  %vm3966_vm4 = vcmp.lt.s32.totalorder %v419_v1, 128  ;;  %s2775_s10 = scalar_lea.vmem %s2774_s9, 64 }
  0x18   : > { %316 = vmatprep.subr.bf16.mxu0 %v2911_v7  ;;  %v222_v18 = vld [vmem:[%s2949_s20] sm:$0xff]  ;;  %v223_v19 = vld [vmem:[%s2949_s20 + $0x8] sm:$0xff]  ;;  %v224_v21 = vld [vmem:[%s2949_s20 + $0x10] sm:$0xff] }
  0x19   : > { %317 = vmatpush1.bf16.msra.mxu0 %v2913_v8  ;;  %v2944_v16 = vrot.slane %v2923_v10, %v441_v15  ;;  %v238_v20 = vpack.c.bf16 %v223_v19, %v222_v18  ;;  %v225_v22 = vld [vmem:[%s2949_s20 + $0x18] sm:$0xff]  ;;  %v226_v24 = vld [vmem:[%s2949_s20 + $0x20] sm:$0xff]  ;;  %v227_v25 = vld [vmem:[%s2949_s20 + $0x28] sm:$0xff] }
  0x1a   : > { %318 = vmatprep.subr.bf16.mxu0 %v2605_v9  ;;  %v239_v23 = vpack.c.bf16 %v225_v22, %v224_v21  ;;  %v240_v26 = vpack.c.bf16 %v227_v25, %v226_v24  ;;  %v228_v27 = vld [vmem:[%s2949_s20 + $0x30] sm:$0xff]  ;;  %v229_v28 = vld [vmem:[%s2949_s20 + $0x38] sm:$0xff]  ;;  %v230_v30 = vld [vmem:[%s2949_s20 + $0x40] sm:$0xff] }
  0x1b   : > { %444 = vrot.lane.b32.xlu0 %v2944_v16, %s2833_s27  ;;  %v241_v29 = vpack.c.bf16 %v229_v28, %v228_v27  ;;  %v231_v31 = vld [vmem:[%s2949_s20 + $0x48] sm:$0xff]  ;;  %v232_v33 = vld [vmem:[%s2949_s20 + $0x50] sm:$0xff]  ;;  %v233_v34 = vld [vmem:[%s2949_s20 + $0x58] sm:$0xff]  ;;  %s2325_s27 = sshll.u32 %s3977_s23, 4  ;;  %s2326_s27 = int_to_ptr.vmem [resolvable:$true] %s2325_s27 }
  0x1c   : > { %v242_v32 = vpack.c.bf16 %v231_v31, %v230_v30  ;;  %v243_v35 = vpack.c.bf16 %v233_v34, %v232_v33  ;;  %v234_v36 = vld [vmem:[%s2949_s20 + $0x60] sm:$0xff]  ;;  %v235_v37 = vld [vmem:[%s2949_s20 + $0x68] sm:$0xff]  ;;  %v236_v39 = vld [vmem:[%s2949_s20 + $0x70] sm:$0xff]  ;;  %s2769_s7 = scalar_lea.vmem %s2326_s27, 32  ;;  %p2776_p0 = scmp.lt.s32.totalorder %s2326_s27, %s2774_s9 }
  0x1d   : > { %319 = vmatpush1.bf16.msra.mxu0 %v2607_v11  ;;  %v244_v38 = vpack.c.bf16 %v235_v37, %v234_v36  ;;  %v237_v40 = vld [vmem:[%s2949_s20 + $0x78] sm:$0xff]  ;;  %p2770_p11 = scmp.ne.s32.totalorder %s2326_s27, %s2769_s7  ;;  %p2777_p1 = scmp.lt.s32.totalorder %s2775_s10, %s2769_s7 }
  0x1e   : > { %320 = vmatprep.subr.bf16.mxu0 %v2608_v14  ;;  %v245_v41 = vpack.c.bf16 %v237_v40, %v236_v39 }
  0x1f   : > { %p2771_p12 = pnand %p2770_p11, %p2898_p5  ;;  %p2778_p2 = por %p2777_p1, %p2776_p0 }
  0x21   : > { %321 = vmatpush1.bf16.msra.mxu0 %v2610_v17  ;;  %p2772_p13 = pneg %p2771_p12 }
  0x23   : > { %p2779_p3 = pnand %p2778_p2, %p2772_p13 }
  0x24   : > { %2397 = vmatmul.mubr.msk.bf16.vlgmr.msra.gmra.mxu0 %vm271_vm2, %v238_v20 }
  0x25   : > { %348 = vmatprep.mubr.bf16.mxu0 %v2832_v12 }
  0x2c   : > { %2398 = vmatmul.mubr.msk.bf16.gmra.mxu0 %vm271_vm2, %v239_v23 }
  0x2d   : > { %358 = vmatprep.mubr.bf16.mxu0 %v2832_v12 }
  0x34   : > { %2399 = vmatmul.mubr.msk.bf16.gmra.mxu0 %vm271_vm2, %v240_v26 }
  0x35   : > { %368 = vmatprep.mubr.bf16.mxu0 %v2832_v12 }
  0x3c   : > { %2400 = vmatmul.mubr.msk.bf16.gmra.mxu0 %vm271_vm2, %v241_v29 }
  0x3d   : > { %378 = vmatprep.mubr.bf16.mxu0 %v2832_v12 }
  0x44   : > { %2401 = vmatmul.mubr.msk.bf16.gmra.mxu0 %vm271_vm2, %v242_v32 }
  0x45   : > { %388 = vmatprep.mubr.bf16.mxu0 %v2832_v12 }
  0x4c   : > { %2402 = vmatmul.mubr.msk.bf16.gmra.mxu0 %vm271_vm2, %v243_v35 }
  0x4d   : > { %398 = vmatprep.mubr.bf16.mxu0 %v2832_v12 }
  0x54   : > { %2403 = vmatmul.mubr.msk.bf16.gmra.mxu0 %vm271_vm2, %v244_v38 }
  0x55   : > { %408 = vmatprep.mubr.bf16.mxu0 %v2832_v12 }
  0x5c   : > { %2404 = vmatmul.mubr.msk.bf16.gmra.mxu0 %vm271_vm2, %v245_v41 }
  0x8d   : > { %v2988_v43 = vpop.permute.xlu0 %444 }
  0xe4   : > { %v2986_v42 = vpop.f32.mrf.mxu0 }
  0xe6   : > { %v342_v44 = vpop.f32.mrf.mxu0 }
  0xe7   : > { %v447_v45 = vadd.f32 %v2988_v43, %v342_v44 }
  0xe8   : > { %v2991_v46 = vpop.f32.mrf.mxu0 }
  0xe9   : > { %v463_v47 = vmul.f32 0.0078125, %v447_v45 }
  0xea   : > { %v346_v48 = vpop.f32.mrf.mxu0 }
  0xeb   : > { %v448_v49 = vadd.f32 %v2988_v43, %v346_v48  ;;  %481 = vperm.xlu0 %2601, %v463_v47  }
  0xec   : > { %v2994_v50 = vpop.f32.mrf.mxu0 }
  0xed   : > { %v464_v51 = vmul.f32 0.0078125, %v448_v49 }
  0xee   : > { %v352_v52 = vpop.f32.mrf.mxu0 }
  0xef   : > { %v449_v53 = vadd.f32 %v2988_v43, %v352_v52  ;;  %486 = vperm.xlu1 %2602, %v464_v51  }
  0xf0   : > { %v2997_v54 = vpop.f32.mrf.mxu0 }
  0xf1   : > { %v465_v55 = vmul.f32 0.0078125, %v449_v53 }
  0xf2   : > { %v356_v56 = vpop.f32.mrf.mxu0 }
  0xf3   : > { %v450_v57 = vadd.f32 %v2988_v43, %v356_v56  ;;  %491 = vperm.xlu1 %2602, %v465_v55   ;;  %v421_v55 = vsub.s32 0, %v2931_v13 }
  0xf4   : > { %v3000_v58 = vpop.f32.mrf.mxu0 }
  0xf5   : > { %v466_v59 = vmul.f32 0.0078125, %v450_v57  ;;  %v3038_v56 = vrot.slane %v2923_v10, %v421_v55 }
  0xf6   : > { %v362_v60 = vpop.f32.mrf.mxu0 }
  0xf7   : > { %v451_v61 = vadd.f32 %v2988_v43, %v362_v60  ;;  %496 = vperm.xlu1 %2602, %v466_v59   ;;  %v423_v57 = vadd.f32 %v3038_v56, %v2986_v42 }
  0xf8   : > { %v3003_v62 = vpop.f32.mrf.mxu0 }
  0xf9   : > { %v467_v63 = vmul.f32 0.0078125, %v451_v61  ;;  %v424_v61 = vadd.f32 %v3038_v56, %v2991_v46  ;;  %v426_v46 = vadd.f32 %v3038_v56, %v2997_v54  ;;  %v427_v54 = vadd.f32 %v3038_v56, %v3000_v58  ;;  %v3088_v58 = vld [vmem:[%s4075_s2 + $0x60] ss:$8 sps:$4 sm:$0xff]  }
  0xfa   : > { %v366_v0 = vpop.f32.mrf.mxu0 }
  0xfb   : > { %v452_v2 = vadd.f32 %v2988_v43, %v366_v0  ;;  %501 = vperm.xlu0 %2601, %v467_v63  }
  0xfc   : > { %v3006_v3 = vpop.f32.mrf.mxu0 }
  0xfd   : > { %v468_v4 = vmul.f32 0.0078125, %v452_v2 }
  0xfe   : > { %v372_v5 = vpop.f32.mrf.mxu0 }
  0xff   : > { %v453_v6 = vadd.f32 %v2988_v43, %v372_v5  ;;  %506 = vperm.xlu1 %2602, %v468_v4   ;;  %v425_v4 = vadd.f32 %v3038_v56, %v2994_v50  ;;  %v3065_v50 = vld [vmem:[%s4075_s2 + $0x74] ss:$8 sps:$4 sm:$0xff]  }
 0x100   : > { %v3009_v9 = vpop.f32.mrf.mxu0  ;;  %832 = vmatprep.subr.bf16.mxu1 %v3065_v50 }
 0x101   : > { %v469_v11 = vmul.f32 0.0078125, %v453_v6 }
 0x102   : > { %v376_v14 = vpop.f32.mrf.mxu0 }
 0x103   : > { %v454_v15 = vadd.f32 %v2988_v43, %v376_v14  ;;  %511 = vperm.xlu0 %2601, %v469_v11  }
 0x104   : > { %v3012_v17 = vpop.f32.mrf.mxu0 }
 0x105   : > { %v470_v18 = vmul.f32 0.0078125, %v454_v15 }
 0x106   : > { %v382_v19 = vpop.f32.mrf.mxu0 }
 0x107   : > { %v455_v20 = vadd.f32 %v2988_v43, %v382_v19  ;;  %516 = vperm.xlu1 %2602, %v470_v18   ;;  %v3070_v18 = vld [vmem:[%s4075_s2 + $0x70] ss:$8 sps:$4 sm:$0xff]  }
 0x108   : > { %v3015_v21 = vpop.f32.mrf.mxu0  ;;  %833 = vmatpush1.bf16.msra.mxu1 %v3070_v18 }
 0x109   : > { %v471_v22 = vmul.f32 0.0078125, %v455_v20  ;;  %v432_v55 = vadd.f32 %v3038_v56, %v3015_v21  ;;  %v3178_v21 = vld [vmem:[%s4075_s2 + $0x10] ss:$8 sps:$4 sm:$0xff]  }
 0x10a   : > { %v386_v23 = vpop.f32.mrf.mxu0 }
 0x10b   : > { %v456_v24 = vadd.f32 %v2988_v43, %v386_v23  ;;  %521 = vperm.xlu0 %2601, %v471_v22   ;;  %v3083_v23 = vld [vmem:[%s4075_s2 + $0x64] ss:$8 sps:$4 sm:$0xff]  }
 0x10c   : > { %v3018_v25 = vpop.f32.mrf.mxu0  ;;  %834 = vmatprep.subr.bf16.mxu1 %v3083_v23 }
 0x10d   : > { %v472_v26 = vmul.f32 0.0078125, %v456_v24  ;;  %v428_v24 = vadd.f32 %v3038_v56, %v3003_v62  ;;  %835 = vmatpush1.bf16.msra.mxu1 %v3088_v58  ;;  %v3106_v62 = vld [vmem:[%s4075_s2 + $0x50] ss:$8 sps:$4 sm:$0xff]  }
 0x10e   : > { %v392_v27 = vpop.f32.mrf.mxu0 }
 0x10f   : > { %v457_v28 = vadd.f32 %v2988_v43, %v392_v27  ;;  %526 = vperm.xlu1 %2602, %v472_v26  }
 0x110   : > { %v3021_v29 = vpop.f32.mrf.mxu0 }
 0x111   : > { %v473_v30 = vmul.f32 0.0078125, %v457_v28 }
 0x112   : > { %v396_v31 = vpop.f32.mrf.mxu0 }
 0x113   : > { %v458_v32 = vadd.f32 %v2988_v43, %v396_v31  ;;  %531 = vperm.xlu0 %2601, %v473_v30   ;;  %v3101_v30 = vld [vmem:[%s4075_s2 + $0x54] ss:$8 sps:$4 sm:$0xff]   ;;  %v429_v31 = vadd.f32 %v3038_v56, %v3006_v3  ;;  %v3124_v3 = vld [vmem:[%s4075_s2 + $0x40] ss:$8 sps:$4 sm:$0xff]  }
 0x114   : > { %v3024_v33 = vpop.f32.mrf.mxu0  ;;  %836 = vmatprep.subr.bf16.mxu1 %v3101_v30 }
 0x115   : > { %v474_v34 = vmul.f32 0.0078125, %v458_v32  ;;  %837 = vmatpush1.bf16.msra.mxu1 %v3106_v62 }
 0x116   : > { %v402_v35 = vpop.f32.mrf.mxu0 }
 0x117   : > { %v459_v36 = vadd.f32 %v2988_v43, %v402_v35  ;;  %536 = vperm.xlu1 %2602, %v474_v34  }
 0x118   : > { %v3027_v37 = vpop.f32.mrf.mxu0 }
 0x119   : > { %v475_v38 = vmul.f32 0.0078125, %v459_v36  ;;  %v3119_v36 = vld [vmem:[%s4075_s2 + $0x44] ss:$8 sps:$4 sm:$0xff]  }
 0x11a   : > { %v406_v39 = vpop.f32.mrf.mxu0  ;;  %838 = vmatprep.subr.bf16.mxu1 %v3119_v36 }
 0x11b   : > { %v460_v40 = vadd.f32 %v2988_v43, %v406_v39  ;;  %541 = vperm.xlu0 %2601, %v475_v38   ;;  %v430_v38 = vadd.f32 %v3038_v56, %v3009_v9  ;;  %839 = vmatpush1.bf16.msra.mxu1 %v3124_v3  ;;  %v3142_v9 = vld [vmem:[%s4075_s2 + $0x30] ss:$8 sps:$4 sm:$0xff]  }
 0x11c   : > { %v3030_v41 = vpop.f32.mrf.mxu0 }
 0x11d   : > { %v476_v44 = vmul.f32 0.0078125, %v460_v40 }
 0x11e   : > { %v412_v45 = vpop.f32.mrf.mxu0 }
 0x11f   : > { %v461_v47 = vadd.f32 %v2988_v43, %v412_v45  ;;  %546 = vperm.xlu1 %2602, %v476_v44   ;;  %v3137_v45 = vld [vmem:[%s4075_s2 + $0x34] ss:$8 sps:$4 sm:$0xff]  }
 0x120   : > { %v3033_v48 = vpop.f32.mrf.mxu0  ;;  %840 = vmatprep.subr.bf16.mxu1 %v3137_v45 }
 0x121   : > { %v477_v49 = vmul.f32 0.0078125, %v461_v47  ;;  %v431_v47 = vadd.f32 %v3038_v56, %v3012_v17  ;;  %841 = vmatpush1.bf16.msra.mxu1 %v3142_v9  ;;  %v3160_v17 = vld [vmem:[%s4075_s2 + $0x20] ss:$8 sps:$4 sm:$0xff]  }
 0x122   : > { %v416_v51 = vpop.f32.mrf.mxu0 }
 0x123   : > { %v462_v52 = vadd.f32 %v2988_v43, %v416_v51  ;;  %551 = vperm.xlu0 %2601, %v477_v49  }
 0x125   : > { %v478_v53 = vmul.f32 0.0078125, %v462_v52 }
 0x127   : > { %556 = vperm.xlu1 %2602, %v478_v53   ;;  %v3155_v53 = vld [vmem:[%s4075_s2 + $0x24] ss:$8 sps:$4 sm:$0xff]  }
 0x128   : > { %842 = vmatprep.subr.bf16.mxu1 %v3155_v53 }
 0x129   : > { %843 = vmatpush1.bf16.msra.mxu1 %v3160_v17 }
 0x166   : > { %v482_v59 = vpop.permute.xlu0 %481 }
 0x167   : > { %v3042_v60 = vsub.f32 %v423_v57, %v482_v59 }
 0x169   : > { %v575_v63 = vmul.f32 %v3042_v60, %v3042_v60 }
 0x16a   : > { %v487_v0 = vpop.permute.xlu1 %486 }
 0x16b   : > { %v3048_v2 = vsub.f32 %v424_v61, %v487_v0  ;;  %591 = vadd.xlane.f32.xlu0 %v575_v63  ;;  %v3173_v63 = vld [vmem:[%s4075_s2 + $0x14] ss:$8 sps:$4 sm:$0xff]   ;;  %v433_v0 = vadd.f32 %v3038_v56, %v3018_v25  ;;  %v3196_v25 = vld [vmem:[%s4075_s2] ss:$8 sps:$4 sm:$0xff]  }
 0x16c   : > { %844 = vmatprep.subr.bf16.mxu1 %v3173_v63 }
 0x16d   : > { %v576_v5 = vmul.f32 %v3048_v2, %v3048_v2  ;;  %845 = vmatpush1.bf16.msra.mxu1 %v3178_v21 }
 0x16e   : > { %v492_v42 = vpop.permute.xlu1 %491 }
 0x16f   : > { %v3054_v6 = vsub.f32 %v425_v4, %v492_v42  ;;  %593 = vadd.xlane.f32.xlu1 %v576_v5 }
 0x171   : > { %v577_v11 = vmul.f32 %v3054_v6, %v3054_v6 }
 0x172   : > { %v497_v14 = vpop.permute.xlu1 %496 }
 0x173   : > { %v3060_v15 = vsub.f32 %v426_v46, %v497_v14  ;;  %595 = vadd.xlane.f32.xlu0 %v577_v11  ;;  %v3191_v46 = vld [vmem:[%s4075_s2 + $0x4] ss:$8 sps:$4 sm:$0xff]   ;;  %v434_v11 = vadd.f32 %v3038_v56, %v3021_v29 }
 0x174   : > { %846 = vmatprep.subr.bf16.mxu1 %v3191_v46 }
 0x175   : > { %v578_v19 = vmul.f32 %v3060_v15, %v3060_v15  ;;  %847 = vmatpush1.bf16.msra.mxu1 %v3196_v25 }
 0x176   : > { %v502_v20 = vpop.permute.xlu0 %501  ;;  %1821 = vmatprep.subr.bf16.mxu1 %v3065_v50 }
 0x177   : > { %v3078_v22 = vsub.f32 %v427_v54, %v502_v20  ;;  %597 = vadd.xlane.f32.xlu0 %v578_v19  ;;  %v435_v20 = vadd.f32 %v3038_v56, %v3024_v33  ;;  %v437_v33 = vadd.f32 %v3038_v56, %v3030_v41 }
 0x179   : > { %v579_v26 = vmul.f32 %v3078_v22, %v3078_v22 }
 0x17a   : > { %v507_v27 = vpop.permute.xlu1 %506 }
 0x17b   : > { %v3096_v28 = vsub.f32 %v428_v24, %v507_v27  ;;  %599 = vadd.xlane.f32.xlu1 %v579_v26  ;;  %v436_v27 = vadd.f32 %v3038_v56, %v3027_v37  ;;  %v438_v37 = vadd.f32 %v3038_v56, %v3033_v48 }
 0x17d   : > { %v580_v32 = vmul.f32 %v3096_v28, %v3096_v28 }
 0x17e   : > { %v512_v34 = vpop.permute.xlu0 %511 }
 0x17f   : > { %v3114_v35 = vsub.f32 %v429_v31, %v512_v34  ;;  %601 = vadd.xlane.f32.xlu0 %v580_v32 }
 0x181   : > { %v581_v39 = vmul.f32 %v3114_v35, %v3114_v35 }
 0x182   : > { %v517_v40 = vpop.permute.xlu1 %516 }
 0x183   : > { %v3132_v44 = vsub.f32 %v430_v38, %v517_v40  ;;  %603 = vadd.xlane.f32.xlu1 %v581_v39 }
 0x185   : > { %v582_v49 = vmul.f32 %v3132_v44, %v3132_v44 }
 0x186   : > { %v522_v51 = vpop.permute.xlu0 %521 }
 0x187   : > { %v3150_v52 = vsub.f32 %v431_v47, %v522_v51  ;;  %605 = vadd.xlane.f32.xlu0 %v582_v49 }
 0x189   : > { %v583_v57 = vmul.f32 %v3150_v52, %v3150_v52 }
 0x18a   : > { %v527_v59 = vpop.permute.xlu1 %526 }
 0x18b   : > { %v3168_v61 = vsub.f32 %v432_v55, %v527_v59  ;;  %607 = vadd.xlane.f32.xlu1 %v583_v57 }
 0x18d   : > { %v584_v4 = vmul.f32 %v3168_v61, %v3168_v61 }
 0x18e   : > { %v532_v5 = vpop.permute.xlu0 %531 }
 0x18f   : > { %v3186_v42 = vsub.f32 %v433_v0, %v532_v5  ;;  %609 = vadd.xlane.f32.xlu0 %v584_v4 }
 0x191   : > { %v585_v14 = vmul.f32 %v3186_v42, %v3186_v42 }
 0x192   : > { %v537_v54 = vpop.permute.xlu1 %536 }
 0x193   : > { %v3204_v19 = vsub.f32 %v434_v11, %v537_v54  ;;  %611 = vadd.xlane.f32.xlu1 %v585_v14  ;;  %v690_v54 = vsub.s32 1, %v2931_v13 }
 0x195   : > { %v586_v24 = vmul.f32 %v3204_v19, %v3204_v19 }
 0x196   : > { %v542_v29 = vpop.permute.xlu0 %541 }
 0x197   : > { %v3211_v26 = vsub.f32 %v435_v20, %v542_v29  ;;  %613 = vadd.xlane.f32.xlu0 %v586_v24  ;;  %v710_v29 = vsub.s32 2, %v2931_v13 }
 0x199   : > { %v587_v31 = vmul.f32 %v3211_v26, %v3211_v26 }
 0x19a   : > { %v547_v32 = vpop.permute.xlu1 %546 }
 0x19b   : > { %v3217_v34 = vsub.f32 %v436_v27, %v547_v32  ;;  %615 = vadd.xlane.f32.xlu1 %v587_v31  ;;  %v3237_v27 = vrot.slane %v2923_v10, %v690_v54 }
 0x19d   : > { %v588_v50 = vmul.f32 %v3217_v34, %v3217_v34 }
 0x19e   : > { %v552_v38 = vpop.permute.xlu0 %551 }
 0x19f   : > { %v3223_v39 = vsub.f32 %v437_v33, %v552_v38  ;;  %617 = vadd.xlane.f32.xlu0 %v588_v50  ;;  %v3241_v38 = vrot.slane %v2923_v10, %v710_v29 }
 0x1a1   : > { %v589_v40 = vmul.f32 %v3223_v39, %v3223_v39 }
 0x1a2   : > { %v557_v47 = vpop.permute.xlu1 %556 }
 0x1a3   : > { %v3229_v49 = vsub.f32 %v438_v37, %v557_v47  ;;  %619 = vadd.xlane.f32.xlu1 %v589_v40 }
 0x1a5   : > { %v590_v41 = vmul.f32 %v3229_v49, %v3229_v49 }
 0x1a7   : > { %621 = vadd.xlane.f32.xlu0 %v590_v41 }
 0x1b4   : > { %965 = vrot.lane.b32.xlu1 %v2944_v16, %s2834_s28 }
 0x1f4   : > { %v592_v51 = vpop.xlane.xlu0 %591 }
 0x1f5   : > { %v624_v55 = vmul.f32 0.0078125, %v592_v51 }
 0x1f7   : > { %v640_v57 = vadd.f32 1e-05, %v624_v55 }
 0x1f8   : > { %v594_v59 = vpop.xlane.xlu1 %593 }
 0x1f9   : > { %2635 = vrsqrt.f32 %v640_v57  ;;  %v625_v48 = vmul.f32 0.0078125, %v594_v59 }
 0x1fb   : > { %v641_v0 = vadd.f32 1e-05, %v625_v48 }
 0x1fc   : > { %v596_v4 = vpop.xlane.xlu0 %595 }
 0x1fd   : > { %2637 = vrsqrt.f32 %v641_v0  ;;  %v626_v5 = vmul.f32 0.0078125, %v596_v4 }
 0x1ff   : > { %v642_v11 = vadd.f32 1e-05, %v626_v5 }
 0x200   : > { %v598_v14 = vpop.xlane.xlu0 %597 }
 0x201   : > { %2639 = vrsqrt.f32 %v642_v11  ;;  %v627_v20 = vmul.f32 0.0078125, %v598_v14 }
 0x203   : > { %v643_v24 = vadd.f32 1e-05, %v627_v20 }
 0x204   : > { %v600_v16 = vpop.xlane.xlu1 %599 }
 0x205   : > { %2641 = vrsqrt.f32 %v643_v24  ;;  %v628_v31 = vmul.f32 0.0078125, %v600_v16 }
 0x206   : > { %v2636_v32 = vpop.eup %2635 }
 0x207   : > { %v644_v33 = vadd.f32 1e-05, %v628_v31  ;;  %v672_v50 = vmul.f32 %v2636_v32, %v3042_v60 }
 0x208   : > { %v602_v37 = vpop.xlane.xlu0 %601 }
 0x209   : > { %2643 = vrsqrt.f32 %v644_v33  ;;  %v629_v40 = vmul.f32 0.0078125, %v602_v37  ;;  %v692_v47 = vmul.f32 %v3237_v27, %v672_v50 }
 0x20a   : > { %v2638_v41 = vpop.eup %2637 }
 0x20b   : > { %v645_v51 = vadd.f32 1e-05, %v629_v40  ;;  %v673_v55 = vmul.f32 %v2638_v41, %v3048_v2  ;;  %v712_v59 = vadd.f32 %v3241_v38, %v692_v47 }
 0x20c   : > { %v604_v57 = vpop.xlane.xlu1 %603 }
 0x20d   : > { %2645 = vrsqrt.f32 %v645_v51  ;;  %v630_v48 = vmul.f32 0.0078125, %v604_v57  ;;  %v693_v0 = vmul.f32 %v3237_v27, %v673_v55  ;;  %v728_v14 = vmax.f32 %v712_v59, 0.0 }
 0x20e   : > { %v2640_v60 = vpop.eup %2639 }
 0x20f   : > { %v646_v4 = vadd.f32 1e-05, %v630_v48  ;;  %v713_v10 = vadd.f32 %v3241_v38, %v693_v0  ;;  %v674_v5 = vmul.f32 %v2640_v60, %v3054_v6 }
 0x210   : > { %v606_v11 = vpop.xlane.xlu0 %605 }
 0x211   : > { %2647 = vrsqrt.f32 %v646_v4  ;;  %v631_v54 = vmul.f32 0.0078125, %v606_v11  ;;  %v729_v20 = vmax.f32 %v713_v10, 0.0  ;;  %v694_v2 = vmul.f32 %v3237_v27, %v674_v5 }
 0x212   : > { %v2642_v24 = vpop.eup %2641 }
 0x213   : > { %v647_v29 = vadd.f32 1e-05, %v631_v54  ;;  %v744_v16 = vpack.c.bf16 %v729_v20, %v728_v14  ;;  %v675_v31 = vmul.f32 %v2642_v24, %v3060_v15  ;;  %v714_v33 = vadd.f32 %v3241_v38, %v694_v2 }
 0x214   : > { %v608_v32 = vpop.xlane.xlu1 %607 }
 0x215   : > { %2649 = vrsqrt.f32 %v647_v29  ;;  %v632_v50 = vmul.f32 0.0078125, %v608_v32  ;;  %865 = vmatmul.mubr.bf16.vlgmr.msra.gmra.mxu1 %v744_v16  ;;  %v695_v6 = vmul.f32 %v3237_v27, %v675_v31  ;;  %v730_v51 = vmax.f32 %v714_v33, 0.0 }
 0x216   : > { %v2644_v37 = vpop.eup %2643  ;;  %874 = vmatprep.mubr.bf16.mxu1 %v2832_v12  ;;  %1822 = vmatpush1.bf16.msra.mxu1 %v3070_v18 }
 0x217   : > { %v648_v40 = vadd.f32 1e-05, %v632_v50  ;;  %v715_v47 = vadd.f32 %v3241_v38, %v695_v6  ;;  %v676_v41 = vmul.f32 %v2644_v37, %v3078_v22  ;;  %1823 = vmatprep.subr.bf16.mxu1 %v3083_v23 }
 0x218   : > { %v610_v15 = vpop.xlane.xlu0 %609 }
 0x219   : > { %2651 = vrsqrt.f32 %v648_v40  ;;  %v633_v55 = vmul.f32 0.0078125, %v610_v15  ;;  %v731_v57 = vmax.f32 %v715_v47, 0.0  ;;  %v696_v59 = vmul.f32 %v3237_v27, %v676_v41 }
 0x21a   : > { %v2646_v48 = vpop.eup %2645  ;;  %1824 = vmatpush1.bf16.msra.mxu1 %v3088_v58 }
 0x21b   : > { %v649_v0 = vadd.f32 1e-05, %v633_v55  ;;  %v745_v60 = vpack.c.bf16 %v731_v57, %v730_v51  ;;  %v677_v18 = vmul.f32 %v2646_v48, %v3096_v28  ;;  %1825 = vmatprep.subr.bf16.mxu1 %v3101_v30  ;;  %v716_v22 = vadd.f32 %v3241_v38, %v696_v59 }
 0x21c   : > { %v612_v4 = vpop.xlane.xlu1 %611 }
 0x21d   : > { %2653 = vrsqrt.f32 %v649_v0  ;;  %v634_v23 = vmul.f32 0.0078125, %v612_v4  ;;  %875 = vmatmul.mubr.bf16.gmra.mxu1 %v745_v60  ;;  %v697_v10 = vmul.f32 %v3237_v27, %v677_v18  ;;  %v732_v14 = vmax.f32 %v716_v22, 0.0 }
 0x21e   : > { %v2648_v5 = vpop.eup %2647  ;;  %884 = vmatprep.mubr.bf16.mxu1 %v2832_v12  ;;  %1826 = vmatpush1.bf16.msra.mxu1 %v3106_v62 }
 0x21f   : > { %v650_v58 = vadd.f32 1e-05, %v634_v23  ;;  %v717_v11 = vadd.f32 %v3241_v38, %v697_v10  ;;  %v678_v28 = vmul.f32 %v2648_v5, %v3114_v35  ;;  %1827 = vmatprep.subr.bf16.mxu1 %v3119_v36 }
 0x220   : > { %v614_v30 = vpop.xlane.xlu0 %613 }
 0x221   : > { %2655 = vrsqrt.f32 %v650_v58  ;;  %v635_v54 = vmul.f32 0.0078125, %v614_v30  ;;  %v733_v20 = vmax.f32 %v717_v11, 0.0  ;;  %v698_v2 = vmul.f32 %v3237_v27, %v678_v28 }
 0x222   : > { %v2650_v24 = vpop.eup %2649  ;;  %1828 = vmatpush1.bf16.msra.mxu1 %v3124_v3 }
 0x223   : > { %v651_v29 = vadd.f32 1e-05, %v635_v54  ;;  %v746_v16 = vpack.c.bf16 %v733_v20, %v732_v14  ;;  %v679_v62 = vmul.f32 %v2650_v24, %v3132_v44  ;;  %1829 = vmatprep.subr.bf16.mxu1 %v3137_v45  ;;  %v718_v35 = vadd.f32 %v3241_v38, %v698_v2 }
 0x224   : > { %v616_v31 = vpop.xlane.xlu1 %615 }
 0x225   : > { %2657 = vrsqrt.f32 %v651_v29  ;;  %v636_v36 = vmul.f32 0.0078125, %v616_v31  ;;  %885 = vmatmul.mubr.bf16.gmra.mxu1 %v746_v16  ;;  %v699_v32 = vmul.f32 %v3237_v27, %v679_v62  ;;  %v734_v6 = vmax.f32 %v718_v35, 0.0 }
 0x226   : > { %v2652_v33 = vpop.eup %2651  ;;  %894 = vmatprep.mubr.bf16.mxu1 %v2832_v12  ;;  %1830 = vmatpush1.bf16.msra.mxu1 %v3142_v9 }
 0x227   : > { %v652_v3 = vadd.f32 1e-05, %v636_v36  ;;  %v719_v50 = vadd.f32 %v3241_v38, %v699_v32  ;;  %v680_v44 = vmul.f32 %v2652_v33, %v3150_v52  ;;  %1831 = vmatprep.subr.bf16.mxu1 %v3155_v53 }
 0x228   : > { %v618_v45 = vpop.xlane.xlu0 %617 }
 0x229   : > { %2659 = vrsqrt.f32 %v652_v3  ;;  %v637_v37 = vmul.f32 0.0078125, %v618_v45  ;;  %v735_v40 = vmax.f32 %v719_v50, 0.0  ;;  %v700_v47 = vmul.f32 %v3237_v27, %v680_v44 }
 0x22a   : > { %v2654_v41 = vpop.eup %2653  ;;  %1832 = vmatpush1.bf16.msra.mxu1 %v3160_v17 }
 0x22b   : > { %v653_v15 = vadd.f32 1e-05, %v637_v37  ;;  %v747_v51 = vpack.c.bf16 %v735_v40, %v734_v6  ;;  %v681_v9 = vmul.f32 %v2654_v41, %v3168_v61  ;;  %1833 = vmatprep.subr.bf16.mxu1 %v3173_v63  ;;  %v720_v52 = vadd.f32 %v3241_v38, %v700_v47 }
 0x22c   : > { %v620_v55 = vpop.xlane.xlu1 %619 }
 0x22d   : > { %2661 = vrsqrt.f32 %v653_v15  ;;  %v638_v53 = vmul.f32 0.0078125, %v620_v55  ;;  %895 = vmatmul.mubr.bf16.gmra.mxu1 %v747_v51  ;;  %v701_v57 = vmul.f32 %v3237_v27, %v681_v9  ;;  %v736_v0 = vmax.f32 %v720_v52, 0.0 }
 0x22e   : > { %v2656_v59 = vpop.eup %2655  ;;  %904 = vmatprep.mubr.bf16.mxu1 %v2832_v12  ;;  %1834 = vmatpush1.bf16.msra.mxu1 %v3178_v21 }
 0x22f   : > { %v654_v17 = vadd.f32 1e-05, %v638_v53  ;;  %v721_v48 = vadd.f32 %v3241_v38, %v701_v57  ;;  %v682_v61 = vmul.f32 %v2656_v59, %v3186_v42  ;;  %1835 = vmatprep.subr.bf16.mxu1 %v3191_v46 }
 0x230   : > { %v622_v63 = vpop.xlane.xlu0 %621 }
 0x231   : > { %2663 = vrsqrt.f32 %v654_v17  ;;  %v639_v60 = vmul.f32 0.0078125, %v622_v63  ;;  %v737_v18 = vmax.f32 %v721_v48, 0.0  ;;  %v702_v4 = vmul.f32 %v3237_v27, %v682_v61 }
 0x232   : > { %v2658_v22 = vpop.eup %2657  ;;  %1836 = vmatpush1.bf16.msra.mxu1 %v3196_v25 }
 0x233   : > { %v655_v23 = vadd.f32 1e-05, %v639_v60  ;;  %v748_v10 = vpack.c.bf16 %v737_v18, %v736_v0  ;;  %v683_v21 = vmul.f32 %v2658_v22, %v3204_v19  ;;  %v722_v46 = vadd.f32 %v3241_v38, %v702_v4 }
 0x235   : > { %2665 = vrsqrt.f32 %v655_v23  ;;  %905 = vmatmul.mubr.bf16.gmra.mxu1 %v748_v10  ;;  %v703_v42 = vmul.f32 %v3237_v27, %v683_v21  ;;  %v738_v28 = vmax.f32 %v722_v46, 0.0 }
 0x236   : > { %v2660_v5 = vpop.eup %2659  ;;  %914 = vmatprep.mubr.bf16.mxu1 %v2832_v12 }
 0x237   : > { %v723_v58 = vadd.f32 %v3241_v38, %v703_v42  ;;  %v684_v11 = vmul.f32 %v2660_v5, %v3211_v26  ;;  %v3345_v5 = vpop.permute.xlu1 %965 }
 0x239   : > { %v739_v30 = vmax.f32 %v723_v58, 0.0  ;;  %v704_v25 = vmul.f32 %v3237_v27, %v684_v11 }
 0x23a   : > { %v2662_v14 = vpop.eup %2661 }
 0x23b   : > { %v749_v54 = vpack.c.bf16 %v739_v30, %v738_v28  ;;  %v685_v19 = vmul.f32 %v2662_v14, %v3217_v34  ;;  %v724_v2 = vadd.f32 %v3241_v38, %v704_v25 }
 0x23d   : > { %915 = vmatmul.mubr.bf16.gmra.mxu1 %v749_v54  ;;  %v705_v20 = vmul.f32 %v3237_v27, %v685_v19  ;;  %v740_v16 = vmax.f32 %v724_v2, 0.0 }
 0x23e   : > { %v2664_v24 = vpop.eup %2663  ;;  %924 = vmatprep.mubr.bf16.mxu1 %v2832_v12 }
 0x23f   : > { %v725_v29 = vadd.f32 %v3241_v38, %v705_v20  ;;  %v686_v26 = vmul.f32 %v2664_v24, %v3223_v39 }
 0x241   : > { %v741_v62 = vmax.f32 %v725_v29, 0.0  ;;  %v706_v31 = vmul.f32 %v3237_v27, %v686_v26 }
 0x242   : > { %v2666_v35 = vpop.eup %2665 }
 0x243   : > { %v750_v36 = vpack.c.bf16 %v741_v62, %v740_v16  ;;  %v687_v34 = vmul.f32 %v2666_v35, %v3229_v49  ;;  %v726_v33 = vadd.f32 %v3241_v38, %v706_v31 }
 0x245   : > { %925 = vmatmul.mubr.bf16.gmra.mxu1 %v750_v36  ;;  %v707_v32 = vmul.f32 %v3237_v27, %v687_v34  ;;  %v742_v50 = vmax.f32 %v726_v33, 0.0 }
 0x246   : > { %934 = vmatprep.mubr.bf16.mxu1 %v2832_v12 }
 0x247   : > { %v727_v3 = vadd.f32 %v3241_v38, %v707_v32 }
 0x249   : > { %v743_v44 = vmax.f32 %v727_v3, 0.0 }
 0x24b   : > { %v751_v39 = vpack.c.bf16 %v743_v44, %v742_v50 }
 0x24d   : > { %935 = vmatmul.mubr.bf16.gmra.mxu1 %v751_v39 }
 0x24e   : > { %1853 = vmatprep.mubr.bf16.mxu1 %v2832_v12 }
 0x2d5   : > { %v3313_v45 = vpop.f32.mrf.mxu1 }
 0x2d7   : > { %v3315_v6 = vpop.f32.mrf.mxu1 }
 0x2d9   : > { %v3317_v49 = vpop.f32.mrf.mxu1 }
 0x2db   : > { %v3319_v37 = vpop.f32.mrf.mxu1 }
 0x2dd   : > { %v3321_v40 = vpop.f32.mrf.mxu1 }
 0x2df   : > { %v3323_v47 = vpop.f32.mrf.mxu1 }
 0x2e1   : > { %v3325_v41 = vpop.f32.mrf.mxu1 }
 0x2e3   : > { %v882_v15 = vpop.f32.mrf.mxu1 }
 0x2e4   : > { %v971_v44 = vadd.f32 %v3345_v5, %v882_v15  ;;  %v968_v15 = vadd.f32 %v3345_v5, %v3315_v6 }
 0x2e5   : > { %v3327_v51 = vpop.f32.mrf.mxu1 }
 0x2e7   : > { %v888_v9 = vpop.f32.mrf.mxu1 }
 0x2e8   : > { %v972_v39 = vadd.f32 %v3345_v5, %v888_v9  ;;  %v984_v9 = vmul.f32 0.0078125, %v968_v15 }
 0x2e9   : > { %v3329_v55 = vpop.f32.mrf.mxu1 }
 0x2eb   : > { %v892_v52 = vpop.f32.mrf.mxu1 }
 0x2ec   : > { %v973_v32 = vadd.f32 %v3345_v5, %v892_v52  ;;  %v970_v52 = vadd.f32 %v3345_v5, %v3323_v47 }
 0x2ed   : > { %v3331_v53 = vpop.f32.mrf.mxu1 }
 0x2ef   : > { %v898_v57 = vpop.f32.mrf.mxu1 }
 0x2f0   : > { %v974_v33 = vadd.f32 %v3345_v5, %v898_v57  ;;  %v988_v57 = vmul.f32 0.0078125, %v972_v39 }
 0x2f1   : > { %v3333_v59 = vpop.f32.mrf.mxu1 }
 0x2f3   : > { %v902_v17 = vpop.f32.mrf.mxu1 }
 0x2f4   : > { %v975_v31 = vadd.f32 %v3345_v5, %v902_v17  ;;  %v990_v17 = vmul.f32 0.0078125, %v974_v33 }
 0x2f5   : > { %v3335_v48 = vpop.f32.mrf.mxu1 }
 0x2f6   : > { %v991_v3 = vmul.f32 0.0078125, %v975_v31 }
 0x2f7   : > { %v908_v61 = vpop.f32.mrf.mxu1 }
 0x2f8   : > { %v976_v35 = vadd.f32 %v3345_v5, %v908_v61  ;;  %v969_v61 = vadd.f32 %v3345_v5, %v3319_v37  ;;  %v3370_v37 = vld [vmem:[%s4076_s3] sm:$0xff] }
 0x2f9   : > { %v3337_v63 = vpop.f32.mrf.mxu1 }
 0x2fa   : > { %v992_v50 = vmul.f32 0.0078125, %v976_v35 }
 0x2fb   : > { %v912_v0 = vpop.f32.mrf.mxu1 }
 0x2fc   : > { %v977_v29 = vadd.f32 %v3345_v5, %v912_v0  ;;  %v989_v0 = vmul.f32 0.0078125, %v973_v32 }
 0x2fd   : > { %v3339_v60 = vpop.f32.mrf.mxu1 }
 0x2fe   : > { %v993_v36 = vmul.f32 0.0078125, %v977_v29 }
 0x2ff   : > { %v918_v18 = vpop.f32.mrf.mxu1 }
 0x300   : > { %v978_v26 = vadd.f32 %v3345_v5, %v918_v18  ;;  %v987_v18 = vmul.f32 0.0078125, %v971_v44 }
 0x301   : > { %v3341_v4 = vpop.f32.mrf.mxu1 }
 0x302   : > { %v994_v34 = vmul.f32 0.0078125, %v978_v26 }
 0x303   : > { %v922_v22 = vpop.f32.mrf.mxu1 }
 0x304   : > { %v979_v19 = vadd.f32 %v3345_v5, %v922_v22  ;;  %v985_v22 = vmul.f32 0.0078125, %v969_v61 }
 0x305   : > { %v3343_v23 = vpop.f32.mrf.mxu1 }
 0x306   : > { %v995_v16 = vmul.f32 0.0078125, %v979_v19 }
 0x307   : > { %v928_v10 = vpop.f32.mrf.mxu1 }
 0x308   : > { %v980_v20 = vadd.f32 %v3345_v5, %v928_v10  ;;  %v986_v10 = vmul.f32 0.0078125, %v970_v52 }
 0x309   : > { %v930_v21 = vpop.f32.mrf.mxu1 }
 0x30a   : > { %v996_v62 = vmul.f32 0.0078125, %v980_v20 }
 0x30b   : > { %v932_v42 = vpop.f32.mrf.mxu1 }
 0x30c   : > { %v981_v30 = vadd.f32 %v3345_v5, %v932_v42  ;;  %v947_v42 = vsub.s32 3, %v2931_v13 }
 0x30d   : > { %v936_v46 = vpop.f32.mrf.mxu1 }
 0x30e   : > { %v997_v2 = vmul.f32 0.0078125, %v981_v30  ;;  %v3373_v47 = vrot.slane %v3370_v37, %v947_v42 }
 0x30f   : > { %v938_v58 = vpop.f32.mrf.mxu1 }
 0x310   : > { %v982_v11 = vadd.f32 %v3345_v5, %v938_v58  ;;  %v963_v58 = vadd.f32 %v3373_v47, %v936_v46  ;;  %v962_v6 = vadd.f32 %v3373_v47, %v930_v21  ;;  %v960_v46 = vadd.f32 %v3373_v47, %v3341_v4 }
 0x311   : > { %v940_v28 = vpop.f32.mrf.mxu1  ;;  %v958_v4 = vadd.f32 %v3373_v47, %v3337_v63  ;;  %v956_v63 = vadd.f32 %v3373_v47, %v3333_v59  ;;  %v954_v59 = vadd.f32 %v3373_v47, %v3329_v55  ;;  %v952_v55 = vadd.f32 %v3373_v47, %v3325_v41 }
 0x312   : > { %v998_v25 = vmul.f32 0.0078125, %v982_v11  ;;  %v950_v41 = vadd.f32 %v3373_v47, %v3317_v49  ;;  %v949_v49 = vadd.f32 %v3373_v47, %v3313_v45 }
 0x313   : > { %v942_v14 = vpop.f32.mrf.mxu1 }
 0x314   : > { %v983_v54 = vadd.f32 %v3345_v5, %v942_v14  ;;  %1072 = vperm.xlu1 %2602, %v998_v25   ;;  %v964_v25 = vadd.f32 %v3373_v47, %v940_v28 }
 0x316   : > { %v999_v24 = vmul.f32 0.0078125, %v983_v54 }
 0x318   : > { %1077 = vperm.xlu0 %2601, %v999_v24   ;;  %1067 = vperm.xlu1 %2602, %v997_v2   ;;  %v961_v24 = vadd.f32 %v3373_v47, %v3343_v23  ;;  %v959_v23 = vadd.f32 %v3373_v47, %v3339_v60  ;;  %v957_v60 = vadd.f32 %v3373_v47, %v3335_v48 }
 0x319   : > { %v955_v48 = vadd.f32 %v3373_v47, %v3331_v53  ;;  %v953_v53 = vadd.f32 %v3373_v47, %v3327_v51  ;;  %v951_v51 = vadd.f32 %v3373_v47, %v3321_v40 }
 0x31c   : > { %1062 = vperm.xlu0 %2601, %v996_v62   ;;  %1057 = vperm.xlu1 %2602, %v995_v16  }
 0x320   : > { %1052 = vperm.xlu0 %2601, %v994_v34   ;;  %1047 = vperm.xlu1 %2602, %v993_v36  }
 0x324   : > { %1042 = vperm.xlu0 %2601, %v992_v50   ;;  %1037 = vperm.xlu1 %2602, %v991_v3  }
 0x328   : > { %1032 = vperm.xlu0 %2601, %v990_v17   ;;  %1027 = vperm.xlu1 %2602, %v989_v0  }
 0x32c   : > { %1022 = vperm.xlu0 %2601, %v988_v57   ;;  %1017 = vperm.xlu1 %2602, %v987_v18  }
 0x330   : > { %1012 = vperm.xlu0 %2601, %v986_v10   ;;  %1007 = vperm.xlu1 %2602, %v985_v22  }
 0x334   : > { %1002 = vperm.xlu0 %2601, %v984_v9  }
 0x38f   : > { %v1073_v11 = vpop.permute.xlu1 %1072 }
 0x390   : > { %v3376_v30 = vsub.f32 %v963_v58, %v1073_v11 }
 0x392   : > { %v1110_v14 = vmul.f32 %v3376_v30, %v3376_v30 }
 0x393   : > { %v1078_v54 = vpop.permute.xlu0 %1077  ;;  %v1068_v19 = vpop.permute.xlu1 %1067 }
 0x394   : > { %v3382_v20 = vsub.f32 %v964_v25, %v1078_v54  ;;  %v3384_v2 = vsub.f32 %v962_v6, %v1068_v19  ;;  %1140 = vadd.xlane.f32.xlu0 %v1110_v14 }
 0x396   : > { %v1111_v21 = vmul.f32 %v3382_v20, %v3382_v20  ;;  %v1109_v28 = vmul.f32 %v3384_v2, %v3384_v2 }
 0x397   : > { %v1063_v29 = vpop.permute.xlu0 %1062  ;;  %v1058_v26 = vpop.permute.xlu1 %1057 }
 0x398   : > { %v3394_v16 = vsub.f32 %v961_v24, %v1063_v29  ;;  %v3396_v62 = vsub.f32 %v960_v46, %v1058_v26  ;;  %1142 = vadd.xlane.f32.xlu1 %v1111_v21  ;;  %1138 = vadd.xlane.f32.xlu0 %v1109_v28 }
 0x39a   : > { %v1108_v31 = vmul.f32 %v3394_v16, %v3394_v16  ;;  %v1107_v35 = vmul.f32 %v3396_v62, %v3396_v62 }
 0x39b   : > { %v1053_v36 = vpop.permute.xlu0 %1052  ;;  %v1048_v34 = vpop.permute.xlu1 %1047 }
 0x39c   : > { %v3406_v32 = vsub.f32 %v959_v23, %v1053_v36  ;;  %v3408_v33 = vsub.f32 %v958_v4, %v1048_v34  ;;  %1136 = vadd.xlane.f32.xlu1 %v1108_v31  ;;  %1134 = vadd.xlane.f32.xlu0 %v1107_v35  ;;  %v2835_v4 = vmov 0.0  }
 0x39d   : > { %2486 = vmatprep.subr.mxu0 %v2835_v4  ;;  %2518 = vmatprep.mubr.msk.f32.mxu0 %vm2836_vm3, %v2835_v4 }
 0x39e   : > { %v1106_v3 = vmul.f32 %v3406_v32, %v3406_v32  ;;  %v1105_v50 = vmul.f32 %v3408_v33, %v3408_v33 }
 0x39f   : > { %v1043_v44 = vpop.permute.xlu0 %1042  ;;  %v1038_v39 = vpop.permute.xlu1 %1037 }
 0x3a0   : > { %v3418_v0 = vsub.f32 %v957_v60, %v1043_v44  ;;  %v3420_v17 = vsub.f32 %v956_v63, %v1038_v39  ;;  %1132 = vadd.xlane.f32.xlu1 %v1106_v3  ;;  %1130 = vadd.xlane.f32.xlu0 %v1105_v50 }
 0x3a2   : > { %v1104_v61 = vmul.f32 %v3418_v0, %v3418_v0  ;;  %v1103_v52 = vmul.f32 %v3420_v17, %v3420_v17 }
 0x3a3   : > { %v1033_v18 = vpop.permute.xlu0 %1032  ;;  %v1028_v57 = vpop.permute.xlu1 %1027 }
 0x3a4   : > { %v3430_v22 = vsub.f32 %v955_v48, %v1033_v18  ;;  %v3432_v10 = vsub.f32 %v954_v59, %v1028_v57  ;;  %1128 = vadd.xlane.f32.xlu1 %v1104_v61  ;;  %1126 = vadd.xlane.f32.xlu0 %v1103_v52 }
 0x3a6   : > { %v1102_v15 = vmul.f32 %v3430_v22, %v3430_v22  ;;  %v1101_v9 = vmul.f32 %v3432_v10, %v3432_v10 }
 0x3a7   : > { %v1023_v42 = vpop.permute.xlu0 %1022  ;;  %v1018_v58 = vpop.permute.xlu1 %1017 }
 0x3a8   : > { %v3442_v11 = vsub.f32 %v953_v53, %v1023_v42  ;;  %v3444_v6 = vsub.f32 %v952_v55, %v1018_v58  ;;  %1124 = vadd.xlane.f32.xlu1 %v1102_v15  ;;  %1122 = vadd.xlane.f32.xlu0 %v1101_v9  ;;  %v1210_v55 = vsub.s32 4, %v2931_v13  ;;  %v1230_v58 = vsub.s32 5, %v2931_v13 }
 0x3aa   : > { %v1100_v25 = vmul.f32 %v3442_v11, %v3442_v11  ;;  %v1099_v14 = vmul.f32 %v3444_v6, %v3444_v6 }
 0x3ab   : > { %v1013_v54 = vpop.permute.xlu0 %1012  ;;  %v1008_v19 = vpop.permute.xlu1 %1007 }
 0x3ac   : > { %v3454_v46 = vsub.f32 %v951_v51, %v1013_v54  ;;  %v3456_v24 = vsub.f32 %v950_v41, %v1008_v19  ;;  %1120 = vadd.xlane.f32.xlu1 %v1100_v25  ;;  %1118 = vadd.xlane.f32.xlu0 %v1099_v14  ;;  %v3474_v51 = vrot.slane %v3370_v37, %v1210_v55 }
 0x3ae   : > { %v1098_v40 = vmul.f32 %v3454_v46, %v3454_v46  ;;  %v1097_v21 = vmul.f32 %v3456_v24, %v3456_v24 }
 0x3af   : > { %v1003_v28 = vpop.permute.xlu0 %1002 }
 0x3b0   : > { %v3464_v29 = vsub.f32 %v949_v49, %v1003_v28  ;;  %1116 = vadd.xlane.f32.xlu1 %v1098_v40  ;;  %1114 = vadd.xlane.f32.xlu0 %v1097_v21  ;;  %v3479_v21 = vrot.slane %v3370_v37, %v1230_v58 }
 0x3b2   : > { %v1096_v26 = vmul.f32 %v3464_v29, %v3464_v29 }
 0x3b4   : > { %1112 = vadd.xlane.f32.xlu1 %v1096_v26 }
 0x41d   : > { %v1141_v45 = vpop.xlane.xlu0 %1140 }
 0x41e   : > { %v1158_v23 = vmul.f32 0.0078125, %v1141_v45 }
 0x420   : > { %v1174_v31 = vadd.f32 1e-05, %v1158_v23 }
 0x421   : > { %v1143_v35 = vpop.xlane.xlu1 %1142  ;;  %v1139_v36 = vpop.xlane.xlu0 %1138 }
 0x422   : > { %2667 = vrsqrt.f32 %v1174_v31  ;;  %v1159_v34 = vmul.f32 0.0078125, %v1143_v35  ;;  %v1157_v63 = vmul.f32 0.0078125, %v1139_v36 }
 0x424   : > { %v1175_v60 = vadd.f32 1e-05, %v1159_v34  ;;  %v1173_v3 = vadd.f32 1e-05, %v1157_v63 }
 0x425   : > { %v1137_v50 = vpop.xlane.xlu1 %1136  ;;  %v1135_v44 = vpop.xlane.xlu0 %1134 }
 0x426   : > { %2669 = vrsqrt.f32 %v1175_v60  ;;  %v1156_v39 = vmul.f32 0.0078125, %v1137_v50  ;;  %v1155_v59 = vmul.f32 0.0078125, %v1135_v44 }
 0x427   : > { %2671 = vrsqrt.f32 %v1173_v3 }
 0x428   : > { %v1172_v48 = vadd.f32 1e-05, %v1156_v39  ;;  %v1171_v52 = vadd.f32 1e-05, %v1155_v59 }
 0x429   : > { %v1133_v61 = vpop.xlane.xlu1 %1132  ;;  %v1131_v57 = vpop.xlane.xlu0 %1130 }
 0x42a   : > { %2673 = vrsqrt.f32 %v1172_v48  ;;  %v1154_v18 = vmul.f32 0.0078125, %v1133_v61  ;;  %v1153_v15 = vmul.f32 0.0078125, %v1131_v57 }
 0x42b   : > { %2675 = vrsqrt.f32 %v1171_v52 }
 0x42c   : > { %v1170_v53 = vadd.f32 1e-05, %v1154_v18  ;;  %v1169_v25 = vadd.f32 1e-05, %v1153_v15 }
 0x42d   : > { %v1129_v9 = vpop.xlane.xlu1 %1128  ;;  %v1127_v14 = vpop.xlane.xlu0 %1126 }
 0x42e   : > { %v1152_v41 = vmul.f32 0.0078125, %v1129_v9  ;;  %2677 = vrsqrt.f32 %v1170_v53  ;;  %v1151_v26 = vmul.f32 0.0078125, %v1127_v14 }
 0x42f   : > { %v2668_v42 = vpop.eup %2667  ;;  %2679 = vrsqrt.f32 %v1169_v25 }
 0x430   : > { %v1206_v54 = vmul.f32 %v2668_v42, %v3376_v30  ;;  %v1168_v28 = vadd.f32 1e-05, %v1152_v41  ;;  %v1167_v36 = vadd.f32 1e-05, %v1151_v26 }
 0x431   : > { %v1125_v13 = vpop.xlane.xlu1 %1124 }
 0x432   : > { %v1226_v23 = vmul.f32 %v3474_v51, %v1206_v54  ;;  %2681 = vrsqrt.f32 %v1168_v28  ;;  %v1150_v34 = vmul.f32 0.0078125, %v1125_v13 }
 0x433   : > { %v2670_v19 = vpop.eup %2669  ;;  %2683 = vrsqrt.f32 %v1167_v36 }
 0x434   : > { %v2672_v49 = vpop.eup %2671  ;;  %v1207_v40 = vmul.f32 %v2670_v19, %v3382_v20  ;;  %v1123_v20 = vpop.xlane.xlu0 %1122  ;;  %v1246_v60 = vadd.f32 %v3479_v21, %v1226_v23  ;;  %v1166_v39 = vadd.f32 1e-05, %v1150_v34 }
 0x435   : > { %v1205_v31 = vmul.f32 %v2672_v49, %v3384_v2  ;;  %v1149_v59 = vmul.f32 0.0078125, %v1123_v20  ;;  %v1121_v2 = vpop.xlane.xlu1 %1120 }
 0x436   : > { %v1227_v45 = vmul.f32 %v3474_v51, %v1207_v40  ;;  %v1262_v48 = vmax.f32 %v1246_v60, 0.0  ;;  %2685 = vrsqrt.f32 %v1166_v39 }
 0x437   : > { %v2674_v35 = vpop.eup %2673  ;;  %v1225_v3 = vmul.f32 %v3474_v51, %v1205_v31  ;;  %v1165_v55 = vadd.f32 1e-05, %v1149_v59 }
 0x438   : > { %v1247_v30 = vadd.f32 %v3479_v21, %v1227_v45  ;;  %v1204_v50 = vmul.f32 %v2674_v35, %v3394_v16  ;;  %v2676_v44 = vpop.eup %2675  ;;  %v1148_v16 = vmul.f32 0.0078125, %v1121_v2  ;;  %v1119_v53 = vpop.xlane.xlu0 %1118 }
 0x439   : > { %v1245_v61 = vadd.f32 %v3479_v21, %v1225_v3  ;;  %v1203_v18 = vmul.f32 %v2676_v44, %v3396_v62  ;;  %2687 = vrsqrt.f32 %v1165_v55  ;;  %v1147_v62 = vmul.f32 0.0078125, %v1119_v53  ;;  %v1117_v54 = vpop.xlane.xlu1 %1116 }
 0x43a   : > { %v1263_v63 = vmax.f32 %v1247_v30, 0.0  ;;  %v1224_v52 = vmul.f32 %v3474_v51, %v1204_v50  ;;  %v1164_v25 = vadd.f32 1e-05, %v1148_v16 }
 0x43b   : > { %v2678_v57 = vpop.eup %2677  ;;  %v1261_v15 = vmax.f32 %v1245_v61, 0.0  ;;  %v1223_v42 = vmul.f32 %v3474_v51, %v1203_v18  ;;  %v1163_v26 = vadd.f32 1e-05, %v1147_v62 }
 0x43c   : > { %2487 = vmatpush3.xpose.msra.mxu0 %v1263_v63  ;;  %v1244_v9 = vadd.f32 %v3479_v21, %v1224_v52  ;;  %v1202_v58 = vmul.f32 %v2678_v57, %v3406_v32  ;;  %v2680_v41 = vpop.eup %2679  ;;  %2689 = vrsqrt.f32 %v1164_v25  ;;  %v1146_v32 = vmul.f32 0.0078125, %v1117_v54  ;;  %v1115_v45 = vpop.xlane.xlu0 %1114 }
 0x43d   : > { %2488 = vmatprep.subr.mxu0 %v2835_v4  ;;  %v1243_v49 = vadd.f32 %v3479_v21, %v1223_v42  ;;  %v1201_v28 = vmul.f32 %v2680_v41, %v3408_v33  ;;  %2691 = vrsqrt.f32 %v1163_v26  ;;  %v1145_v34 = vmul.f32 0.0078125, %v1115_v45  ;;  %v1113_v20 = vpop.xlane.xlu1 %1112 }
 0x43e   : > { %v1260_v19 = vmax.f32 %v1244_v9, 0.0  ;;  %v1222_v40 = vmul.f32 %v3474_v51, %v1202_v58  ;;  %v1162_v36 = vadd.f32 1e-05, %v1146_v32  ;;  %v1144_v39 = vmul.f32 0.0078125, %v1113_v20  ;;  %v2765_v20 = vld [vmem:[%s4074_s1 + $0x10] ss:$8 sps:$4 sm:$0xff]  }
 0x43f   : > { %v2682_v14 = vpop.eup %2681  ;;  %v1259_v23 = vmax.f32 %v1243_v49, 0.0  ;;  %v1221_v35 = vmul.f32 %v3474_v51, %v1201_v28  ;;  %v1161_v44 = vadd.f32 1e-05, %v1145_v34  ;;  %v1268_v34 = vrot.slane %v3370_v37, 6 }
 0x440   : > { %2489 = vmatpush3.xpose.msra.mxu0 %v1262_v48  ;;  %v2684_v13 = vpop.eup %2683  ;;  %v1242_v31 = vadd.f32 %v3479_v21, %v1222_v40  ;;  %v1200_v30 = vmul.f32 %v2682_v14, %v3418_v0  ;;  %2693 = vrsqrt.f32 %v1162_v36  ;;  %v1160_v52 = vadd.f32 1e-05, %v1144_v39 }
 0x441   : > { %2490 = vmatprep.subr.mxu0 %v2835_v4  ;;  %v1241_v60 = vadd.f32 %v3479_v21, %v1221_v35  ;;  %v1199_v50 = vmul.f32 %v2684_v13, %v3420_v17  ;;  %2695 = vrsqrt.f32 %v1161_v44  ;;  %v2424_v44 = vld [vmem:[%s2949_s20 + $0x98] sm:$0xff] }
 0x442   : > { %v1258_v63 = vmax.f32 %v1242_v31, 0.0  ;;  %v1220_v3 = vmul.f32 %v3474_v51, %v1200_v30  ;;  %2697 = vrsqrt.f32 %v1160_v52 }
 0x443   : > { %v2686_v33 = vpop.eup %2685  ;;  %v1257_v59 = vmax.f32 %v1241_v60, 0.0  ;;  %v1219_v48 = vmul.f32 %v3474_v51, %v1199_v50  ;;  %v2423_v50 = vld [vmem:[%s2949_s20 + $0x90] sm:$0xff] }
 0x444   : > { %2491 = vmatpush3.xpose.msra.mxu0 %v1261_v15  ;;  %v1240_v2 = vadd.f32 %v3479_v21, %v1220_v3  ;;  %v1198_v61 = vmul.f32 %v2686_v33, %v3430_v22  ;;  %v2764_v33 = vld [vmem:[%s4074_s1 + $0x14] ss:$8 sps:$4 sm:$0xff]   ;;  %v2767_v3 = vld [vmem:[%s4074_s1] ss:$8 sps:$4 sm:$0xff]   ;;  %v1365_v39 = vpack.c.bf16 %v2424_v44, %v2423_v50 }
 0x445   : > { %2492 = vmatprep.subr.mxu0 %v2835_v4  ;;  %v1239_v57 = vadd.f32 %v3479_v21, %v1219_v48  ;;  %v2427_v48 = vld [vmem:[%s2949_s20 + $0xb0] sm:$0xff] }
 0x446   : > { %v2688_v0 = vpop.eup %2687  ;;  %v1256_v18 = vmax.f32 %v1240_v2, 0.0  ;;  %v1218_v55 = vmul.f32 %v3474_v51, %v1198_v61  ;;  %v2428_v61 = vld [vmem:[%s2949_s20 + $0xb8] sm:$0xff] }
 0x447   : > { %v1197_v16 = vmul.f32 %v2688_v0, %v3432_v10  ;;  %v1255_v15 = vmax.f32 %v1239_v57, 0.0  ;;  %v2425_v0 = vld [vmem:[%s2949_s20 + $0xa0] sm:$0xff]  ;;  %v1367_v52 = vpack.c.bf16 %v2428_v61, %v2427_v48 }
 0x448   : > { %2493 = vmatpush3.xpose.msra.mxu0 %v1260_v19  ;;  %v1238_v22 = vadd.f32 %v3479_v21, %v1218_v55  ;;  %v2431_v55 = vld [vmem:[%s2949_s20 + $0xd0] sm:$0xff] }
 0x449   : > { %2494 = vmatprep.subr.mxu0 %v2835_v4  ;;  %v2690_v17 = vpop.eup %2689  ;;  %v1217_v9 = vmul.f32 %v3474_v51, %v1197_v16  ;;  %v2432_v16 = vld [vmem:[%s2949_s20 + $0xd8] sm:$0xff] }
 0x44a   : > { %v2692_v53 = vpop.eup %2691  ;;  %v1196_v42 = vmul.f32 %v2690_v17, %v3442_v11  ;;  %v1254_v41 = vmax.f32 %v1238_v22, 0.0  ;;  %v2429_v17 = vld [vmem:[%s2949_s20 + $0xc0] sm:$0xff]  ;;  %v2434_v22 = vld [vmem:[%s2949_s20 + $0xe8] sm:$0xff] }
 0x44b   : > { %v1237_v25 = vadd.f32 %v3479_v21, %v1217_v9  ;;  %v1195_v62 = vmul.f32 %v2692_v53, %v3444_v6  ;;  %v1369_v53 = vpack.c.bf16 %v2432_v16, %v2431_v55 }
 0x44c   : > { %2495 = vmatpush3.xpose.msra.mxu0 %v1259_v23  ;;  %v1216_v10 = vmul.f32 %v3474_v51, %v1196_v42  ;;  %v2435_v42 = vld [vmem:[%s2949_s20 + $0xf0] sm:$0xff] }
 0x44d   : > { %2496 = vmatprep.subr.mxu0 %v2835_v4  ;;  %v2694_v58 = vpop.eup %2693  ;;  %v1253_v54 = vmax.f32 %v1237_v25, 0.0  ;;  %v1215_v11 = vmul.f32 %v3474_v51, %v1195_v62 }
 0x44e   : > { %v2696_v14 = vpop.eup %2695  ;;  %v1236_v19 = vadd.f32 %v3479_v21, %v1216_v10  ;;  %v1194_v49 = vmul.f32 %v2694_v58, %v3454_v46  ;;  %v2436_v58 = vld [vmem:[%s2949_s20 + $0xf8] sm:$0xff] }
 0x44f   : > { %v2698_v40 = vpop.eup %2697  ;;  %v1235_v26 = vadd.f32 %v3479_v21, %v1215_v11  ;;  %v1193_v32 = vmul.f32 %v2696_v14, %v3456_v24 }
 0x450   : > { %2497 = vmatpush3.xpose.msra.mxu0 %v1258_v63  ;;  %v1252_v28 = vmax.f32 %v1236_v19, 0.0  ;;  %v1214_v6 = vmul.f32 %v3474_v51, %v1194_v49  ;;  %v1192_v46 = vmul.f32 %v2698_v40, %v3464_v29  ;;  %v2422_v63 = vld [vmem:[%s2949_s20 + $0x88] sm:$0xff] }
 0x451   : > { %2498 = vmatprep.subr.mxu0 %v2835_v4  ;;  %v1251_v13 = vmax.f32 %v1235_v26, 0.0  ;;  %v1213_v23 = vmul.f32 %v3474_v51, %v1193_v32 }
 0x452   : > { %v1234_v45 = vadd.f32 %v3479_v21, %v1214_v6  ;;  %v1212_v30 = vmul.f32 %v3474_v51, %v1192_v46 }
 0x453   : > { %v1233_v35 = vadd.f32 %v3479_v21, %v1213_v23 }
 0x454   : > { %2499 = vmatpush3.xpose.msra.mxu0 %v1257_v59  ;;  %v1250_v31 = vmax.f32 %v1234_v45, 0.0  ;;  %v1232_v36 = vadd.f32 %v3479_v21, %v1212_v30  ;;  %v2426_v59 = vld [vmem:[%s2949_s20 + $0xa8] sm:$0xff] }
 0x455   : > { %2500 = vmatprep.subr.mxu0 %v2835_v4  ;;  %v1249_v24 = vmax.f32 %v1233_v35, 0.0  ;;  %v1366_v2 = vpack.c.bf16 %v2426_v59, %v2425_v0 }
 0x456   : > { %v1248_v29 = vmax.f32 %v1232_v36, 0.0 }
 0x458   : > { %2501 = vmatpush3.xpose.msra.mxu0 %v1256_v18  ;;  %v2430_v18 = vld [vmem:[%s2949_s20 + $0xc8] sm:$0xff] }
 0x459   : > { %2502 = vmatprep.subr.mxu0 %v2835_v4  ;;  %v1368_v57 = vpack.c.bf16 %v2430_v18, %v2429_v17 }
 0x45c   : > { %2503 = vmatpush3.xpose.msra.mxu0 %v1255_v15  ;;  %v2433_v15 = vld [vmem:[%s2949_s20 + $0xe0] sm:$0xff] }
 0x45d   : > { %2504 = vmatprep.subr.mxu0 %v2835_v4  ;;  %v1370_v9 = vpack.c.bf16 %v2434_v22, %v2433_v15 }
 0x460   : > { %2505 = vmatpush3.xpose.msra.mxu0 %v1254_v41  ;;  %v1371_v41 = vpack.c.bf16 %v2436_v58, %v2435_v42 }
 0x461   : > { %2506 = vmatprep.subr.mxu0 %v2835_v4 }
 0x464   : > { %2507 = vmatpush3.xpose.msra.mxu0 %v1253_v54 }
 0x465   : > { %2508 = vmatprep.subr.mxu0 %v2835_v4 }
 0x468   : > { %2509 = vmatpush3.xpose.msra.mxu0 %v1252_v28 }
 0x469   : > { %2510 = vmatprep.subr.mxu0 %v2835_v4 }
 0x46c   : > { %2511 = vmatpush3.xpose.msra.mxu0 %v1251_v13 }
 0x46d   : > { %2512 = vmatprep.subr.mxu0 %v2835_v4 }
 0x470   : > { %2513 = vmatpush3.xpose.msra.mxu0 %v1250_v31 }
 0x471   : > { %2514 = vmatprep.subr.mxu0 %v2835_v4 }
 0x474   : > { %2515 = vmatpush3.xpose.msra.mxu0 %v1249_v24 }
 0x475   : > { %2516 = vmatprep.subr.mxu0 %v2835_v4 }
 0x478   : > { %2517 = vmatpush3.xpose.msra.mxu0 %v1248_v29 }
 0x479   : > { %1406 = vmatprep.subr.bf16.mxu0 %v2911_v7  ;;  %v2421_v7 = vld [vmem:[%s2949_s20 + $0x80] sm:$0xff] }
 0x47a   : > { %v1364_v60 = vpack.c.bf16 %v2422_v63, %v2421_v7 }
 0x47b   : > { %2519 = vmatmul.mubr.f32.vlgmr.msra.gmra.mxu0 %v1268_v34 }
 0x47c   : > { %1407 = vmatpush1.bf16.msra.mxu0 %v2913_v8  ;;  %1428 = vmatprep.mubr.bf16.mxu0 %v2832_v12  ;;  %v2766_v8 = vld [vmem:[%s4074_s1 + $0x4] ss:$8 sps:$4 sm:$0xff]  }
 0x47d   : > { %1408 = vmatprep.subr.bf16.mxu0 %v2764_v33 }
 0x480   : > { %1409 = vmatpush1.bf16.msra.mxu0 %v2765_v20 }
 0x481   : > { %1410 = vmatprep.subr.bf16.mxu0 %v2766_v8 }
 0x484   : > { %1411 = vmatpush1.bf16.msra.mxu0 %v2767_v3 }
 0x485   : > { %2521 = vmatprep.subr.mxu0 %v2835_v4 }
 0x487   : > { %2437 = vmatmul.mubr.msk.bf16.vlgmr.msra.gmra.mxu0 %vm271_vm2, %v1364_v60 }
 0x488   : > { %1438 = vmatprep.mubr.bf16.mxu0 %v2832_v12 }
 0x48f   : > { %2438 = vmatmul.mubr.msk.bf16.gmra.mxu0 %vm271_vm2, %v1365_v39 }
 0x490   : > { %1448 = vmatprep.mubr.bf16.mxu0 %v2832_v12 }
 0x497   : > { %2439 = vmatmul.mubr.msk.bf16.gmra.mxu0 %vm271_vm2, %v1366_v2 }
 0x498   : > { %1458 = vmatprep.mubr.bf16.mxu0 %v2832_v12 }
 0x49f   : > { %2440 = vmatmul.mubr.msk.bf16.gmra.mxu0 %vm271_vm2, %v1367_v52 }
 0x4a0   : > { %1468 = vmatprep.mubr.bf16.mxu0 %v2832_v12 }
 0x4a7   : > { %2441 = vmatmul.mubr.msk.bf16.gmra.mxu0 %vm271_vm2, %v1368_v57 }
 0x4a8   : > { %1478 = vmatprep.mubr.bf16.mxu0 %v2832_v12 }
 0x4af   : > { %2442 = vmatmul.mubr.msk.bf16.gmra.mxu0 %vm271_vm2, %v1369_v53 }
 0x4b0   : > { %1488 = vmatprep.mubr.bf16.mxu0 %v2832_v12 }
 0x4b7   : > { %2443 = vmatmul.mubr.msk.bf16.gmra.mxu0 %vm271_vm2, %v1370_v9 }
 0x4b8   : > { %1498 = vmatprep.mubr.bf16.mxu0 %v2832_v12 }
 0x4bf   : > { %2444 = vmatmul.mubr.msk.bf16.gmra.mxu0 %vm271_vm2, %v1371_v41 }
 0x4c0   : > { %2553 = vmatprep.mubr.msk.f32.mxu0 %vm2836_vm3, %v2835_v4 }
 0x53b   : > { %v3594_v25 = vpop.f32.mrf.mxu0 }
 0x53d   : > { %v2520_v10 = vpop.f32.mrf.mxu0 }
 0x547   : > { %v3596_v62 = vpop.f32.mrf.mxu0 }
 0x549   : > { %v1432_v14 = vpop.f32.mrf.mxu0 }
 0x54a   : > { %v1525_v54 = vadd.f32 %v1432_v14, %v2988_v43 }
 0x54b   : > { %v3599_v19 = vpop.f32.mrf.mxu0 }
 0x54c   : > { %v1541_v11 = vmul.f32 0.0078125, %v1525_v54 }
 0x54d   : > { %v1436_v49 = vpop.f32.mrf.mxu0 }
 0x54e   : > { %v1526_v40 = vadd.f32 %v1436_v49, %v2988_v43  ;;  %1559 = vperm.xlu0 %2601, %v1541_v11  }
 0x54f   : > { %v3602_v28 = vpop.f32.mrf.mxu0 }
 0x550   : > { %v1542_v26 = vmul.f32 0.0078125, %v1526_v40 }
 0x551   : > { %v1442_v6 = vpop.f32.mrf.mxu0 }
 0x552   : > { %v1527_v32 = vadd.f32 %v1442_v6, %v2988_v43  ;;  %1564 = vperm.xlu1 %2602, %v1542_v26  }
 0x553   : > { %v3605_v13 = vpop.f32.mrf.mxu0 }
 0x554   : > { %v1543_v45 = vmul.f32 0.0078125, %v1527_v32 }
 0x555   : > { %v1446_v23 = vpop.f32.mrf.mxu0 }
 0x556   : > { %v1528_v46 = vadd.f32 %v1446_v23, %v2988_v43  ;;  %1569 = vperm.xlu1 %2602, %v1543_v45  }
 0x557   : > { %v3608_v31 = vpop.f32.mrf.mxu0 }
 0x558   : > { %v1544_v35 = vmul.f32 0.0078125, %v1528_v46 }
 0x559   : > { %v1452_v30 = vpop.f32.mrf.mxu0 }
 0x55a   : > { %v1529_v24 = vadd.f32 %v1452_v30, %v2988_v43  ;;  %1574 = vperm.xlu0 %2601, %v1544_v35  }
 0x55b   : > { %v3611_v36 = vpop.f32.mrf.mxu0 }
 0x55c   : > { %v1545_v29 = vmul.f32 0.0078125, %v1529_v24 }
 0x55d   : > { %v1456_v33 = vpop.f32.mrf.mxu0 }
 0x55e   : > { %v1530_v20 = vadd.f32 %v1456_v33, %v2988_v43  ;;  %1579 = vperm.xlu1 %2602, %v1545_v29   ;;  %v1509_v29 = vadd.f32 %v3596_v62, %v3038_v56 }
 0x55f   : > { %v3614_v7 = vpop.f32.mrf.mxu0 }
 0x560   : > { %v1546_v63 = vmul.f32 0.0078125, %v1530_v20 }
 0x561   : > { %v1462_v8 = vpop.f32.mrf.mxu0 }
 0x562   : > { %v1531_v60 = vadd.f32 %v1462_v8, %v2988_v43  ;;  %1584 = vperm.xlu0 %2601, %v1546_v63   ;;  %v1510_v63 = vadd.f32 %v3599_v19, %v3038_v56  ;;  %v1512_v19 = vadd.f32 %v3605_v13, %v3038_v56  ;;  %v1514_v13 = vadd.f32 %v3611_v36, %v3038_v56 }
 0x563   : > { %v3617_v3 = vpop.f32.mrf.mxu0 }
 0x564   : > { %v1547_v50 = vmul.f32 0.0078125, %v1531_v60  ;;  %v1516_v36 = vadd.f32 %v3617_v3, %v3038_v56 }
 0x565   : > { %v1466_v44 = vpop.f32.mrf.mxu0 }
 0x566   : > { %v1532_v39 = vadd.f32 %v1466_v44, %v2988_v43  ;;  %1589 = vperm.xlu1 %2602, %v1547_v50  }
 0x567   : > { %v3620_v0 = vpop.f32.mrf.mxu0 }
 0x568   : > { %v1548_v59 = vmul.f32 0.0078125, %v1532_v39 }
 0x569   : > { %v1472_v2 = vpop.f32.mrf.mxu0 }
 0x56a   : > { %v1533_v48 = vadd.f32 %v1472_v2, %v2988_v43  ;;  %1594 = vperm.xlu0 %2601, %v1548_v59  }
 0x56b   : > { %v3623_v61 = vpop.f32.mrf.mxu0 }
 0x56c   : > { %v1549_v52 = vmul.f32 0.0078125, %v1533_v48  ;;  %v1518_v3 = vadd.f32 %v3623_v61, %v3038_v56 }
 0x56d   : > { %v1476_v17 = vpop.f32.mrf.mxu0 }
 0x56e   : > { %v1534_v18 = vadd.f32 %v1476_v17, %v2988_v43  ;;  %1599 = vperm.xlu1 %2602, %v1549_v52  }
 0x56f   : > { %v3626_v57 = vpop.f32.mrf.mxu0 }
 0x570   : > { %v1550_v55 = vmul.f32 0.0078125, %v1534_v18 }
 0x571   : > { %v1482_v16 = vpop.f32.mrf.mxu0 }
 0x572   : > { %v1535_v53 = vadd.f32 %v1482_v16, %v2988_v43  ;;  %1604 = vperm.xlu0 %2601, %v1550_v55  }
 0x573   : > { %v3629_v15 = vpop.f32.mrf.mxu0 }
 0x574   : > { %v1551_v22 = vmul.f32 0.0078125, %v1535_v53  ;;  %v1520_v61 = vadd.f32 %v3629_v15, %v3038_v56 }
 0x575   : > { %v1486_v9 = vpop.f32.mrf.mxu0 }
 0x576   : > { %v1536_v42 = vadd.f32 %v1486_v9, %v2988_v43  ;;  %1609 = vperm.xlu1 %2602, %v1551_v22  }
 0x577   : > { %v3632_v58 = vpop.f32.mrf.mxu0 }
 0x578   : > { %v1552_v41 = vmul.f32 0.0078125, %v1536_v42 }
 0x579   : > { %v1492_v10 = vpop.f32.mrf.mxu0 }
 0x57a   : > { %v1537_v14 = vadd.f32 %v1492_v10, %v2988_v43  ;;  %1614 = vperm.xlu0 %2601, %v1552_v41  }
 0x57b   : > { %v3635_v54 = vpop.f32.mrf.mxu0 }
 0x57c   : > { %v1553_v11 = vmul.f32 0.0078125, %v1537_v14  ;;  %v1522_v15 = vadd.f32 %v3635_v54, %v3038_v56 }
 0x57d   : > { %v1496_v49 = vpop.f32.mrf.mxu0 }
 0x57e   : > { %v1538_v40 = vadd.f32 %v1496_v49, %v2988_v43  ;;  %1619 = vperm.xlu1 %2602, %v1553_v11  }
 0x57f   : > { %v3638_v26 = vpop.f32.mrf.mxu0 }
 0x580   : > { %v1554_v6 = vmul.f32 0.0078125, %v1538_v40 }
 0x581   : > { %v1502_v32 = vpop.f32.mrf.mxu0 }
 0x582   : > { %v1539_v45 = vadd.f32 %v1502_v32, %v2988_v43  ;;  %1624 = vperm.xlu0 %2601, %v1554_v6  }
 0x583   : > { %v3641_v23 = vpop.f32.mrf.mxu0 }
 0x584   : > { %v1555_v46 = vmul.f32 0.0078125, %v1539_v45  ;;  %v1524_v54 = vadd.f32 %v3641_v23, %v3038_v56 }
 0x585   : > { %v1506_v35 = vpop.f32.mrf.mxu0 }
 0x586   : > { %v1540_v30 = vadd.f32 %v1506_v35, %v2988_v43  ;;  %1629 = vperm.xlu1 %2602, %v1555_v46   ;;  %v1511_v43 = vadd.f32 %v3602_v28, %v3038_v56  ;;  %v1513_v28 = vadd.f32 %v3608_v31, %v3038_v56  ;;  %v1515_v31 = vadd.f32 %v3614_v7, %v3038_v56 }
 0x587   : > { %v1517_v7 = vadd.f32 %v3620_v0, %v3038_v56  ;;  %v1519_v0 = vadd.f32 %v3626_v57, %v3038_v56  ;;  %v1521_v57 = vadd.f32 %v3632_v58, %v3038_v56  ;;  %v1523_v58 = vadd.f32 %v3638_v26, %v3038_v56 }
 0x588   : > { %v1556_v24 = vmul.f32 0.0078125, %v1540_v30 }
 0x58a   : > { %1634 = vperm.xlu0 %2601, %v1556_v24  }
 0x5c9   : > { %v1560_v33 = vpop.permute.xlu0 %1559 }
 0x5ca   : > { %v3646_v20 = vsub.f32 %v1509_v29, %v1560_v33 }
 0x5cc   : > { %v1653_v8 = vmul.f32 %v3646_v20, %v3646_v20 }
 0x5cd   : > { %v1565_v60 = vpop.permute.xlu1 %1564 }
 0x5ce   : > { %v3652_v50 = vsub.f32 %v1510_v63, %v1565_v60  ;;  %1669 = vadd.xlane.f32.xlu1 %v1653_v8 }
 0x5d0   : > { %v1654_v44 = vmul.f32 %v3652_v50, %v3652_v50 }
 0x5d1   : > { %v1570_v62 = vpop.permute.xlu1 %1569 }
 0x5d2   : > { %v3658_v39 = vsub.f32 %v1511_v43, %v1570_v62  ;;  %1671 = vadd.xlane.f32.xlu0 %v1654_v44 }
 0x5d4   : > { %v1655_v59 = vmul.f32 %v3658_v39, %v3658_v39 }
 0x5d5   : > { %v1575_v2 = vpop.permute.xlu0 %1574 }
 0x5d6   : > { %v3664_v48 = vsub.f32 %v1512_v19, %v1575_v2  ;;  %1673 = vadd.xlane.f32.xlu0 %v1655_v59 }
 0x5d8   : > { %v1656_v52 = vmul.f32 %v3664_v48, %v3664_v48 }
 0x5d9   : > { %v1580_v17 = vpop.permute.xlu1 %1579 }
 0x5da   : > { %v3670_v18 = vsub.f32 %v1513_v28, %v1580_v17  ;;  %1675 = vadd.xlane.f32.xlu1 %v1656_v52 }
 0x5dc   : > { %v1657_v55 = vmul.f32 %v3670_v18, %v3670_v18 }
 0x5dd   : > { %v1585_v16 = vpop.permute.xlu0 %1584 }
 0x5de   : > { %v3676_v53 = vsub.f32 %v1514_v13, %v1585_v16  ;;  %1677 = vadd.xlane.f32.xlu0 %v1657_v55 }
 0x5e0   : > { %v1658_v22 = vmul.f32 %v3676_v53, %v3676_v53 }
 0x5e1   : > { %v1590_v9 = vpop.permute.xlu1 %1589 }
 0x5e2   : > { %v3682_v42 = vsub.f32 %v1515_v31, %v1590_v9  ;;  %1679 = vadd.xlane.f32.xlu1 %v1658_v22 }
 0x5e4   : > { %v1659_v41 = vmul.f32 %v3682_v42, %v3682_v42 }
 0x5e5   : > { %v1595_v10 = vpop.permute.xlu0 %1594 }
 0x5e6   : > { %v3688_v14 = vsub.f32 %v1516_v36, %v1595_v10  ;;  %1681 = vadd.xlane.f32.xlu0 %v1659_v41 }
 0x5e8   : > { %v1660_v11 = vmul.f32 %v3688_v14, %v3688_v14 }
 0x5e9   : > { %v1600_v49 = vpop.permute.xlu1 %1599 }
 0x5ea   : > { %v3694_v40 = vsub.f32 %v1517_v7, %v1600_v49  ;;  %1683 = vadd.xlane.f32.xlu1 %v1660_v11 }
 0x5ec   : > { %v1661_v6 = vmul.f32 %v3694_v40, %v3694_v40 }
 0x5ed   : > { %v1605_v32 = vpop.permute.xlu0 %1604 }
 0x5ee   : > { %v3700_v45 = vsub.f32 %v1518_v3, %v1605_v32  ;;  %1685 = vadd.xlane.f32.xlu0 %v1661_v6 }
 0x5f0   : > { %v1662_v46 = vmul.f32 %v3700_v45, %v3700_v45 }
 0x5f1   : > { %v1610_v35 = vpop.permute.xlu1 %1609 }
 0x5f2   : > { %v3706_v30 = vsub.f32 %v1519_v0, %v1610_v35  ;;  %1687 = vadd.xlane.f32.xlu1 %v1662_v46 }
 0x5f4   : > { %v1663_v24 = vmul.f32 %v3706_v30, %v3706_v30 }
 0x5f5   : > { %v1615_v29 = vpop.permute.xlu0 %1614 }
 0x5f6   : > { %v3712_v33 = vsub.f32 %v1520_v61, %v1615_v29  ;;  %1689 = vadd.xlane.f32.xlu0 %v1663_v24 }
 0x5f8   : > { %v1664_v63 = vmul.f32 %v3712_v33, %v3712_v33 }
 0x5f9   : > { %v1620_v8 = vpop.permute.xlu1 %1619 }
 0x5fa   : > { %v3718_v60 = vsub.f32 %v1521_v57, %v1620_v8  ;;  %1691 = vadd.xlane.f32.xlu1 %v1664_v63 }
 0x5fc   : > { %v1665_v43 = vmul.f32 %v3718_v60, %v3718_v60 }
 0x5fd   : > { %v1625_v44 = vpop.permute.xlu0 %1624 }
 0x5fe   : > { %v3724_v62 = vsub.f32 %v1522_v15, %v1625_v44  ;;  %1693 = vadd.xlane.f32.xlu0 %v1665_v43 }
 0x600   : > { %v1666_v19 = vmul.f32 %v3724_v62, %v3724_v62 }
 0x601   : > { %v1630_v59 = vpop.permute.xlu1 %1629 }
 0x602   : > { %v3730_v2 = vsub.f32 %v1523_v58, %v1630_v59  ;;  %1695 = vadd.xlane.f32.xlu1 %v1666_v19 }
 0x604   : > { %v1667_v28 = vmul.f32 %v3730_v2, %v3730_v2 }
 0x605   : > { %v1635_v52 = vpop.permute.xlu0 %1634 }
 0x606   : > { %v3736_v17 = vsub.f32 %v1524_v54, %v1635_v52  ;;  %1697 = vadd.xlane.f32.xlu0 %v1667_v28 }
 0x608   : > { %v1668_v26 = vmul.f32 %v3736_v17, %v3736_v17 }
 0x60a   : > { %1699 = vadd.xlane.f32.xlu1 %v1668_v26 }
 0x657   : > { %v1670_v13 = vpop.xlane.xlu1 %1669 }
 0x658   : > { %v1701_v55 = vmul.f32 0.0078125, %v1670_v13 }
 0x65a   : > { %v1717_v16 = vadd.f32 1e-05, %v1701_v55 }
 0x65b   : > { %v1672_v31 = vpop.xlane.xlu0 %1671 }
 0x65c   : > { %2699 = vrsqrt.f32 %v1717_v16  ;;  %v1702_v22 = vmul.f32 0.0078125, %v1672_v31 }
 0x65e   : > { %v1718_v9 = vadd.f32 1e-05, %v1702_v22 }
 0x65f   : > { %v1674_v36 = vpop.xlane.xlu0 %1673 }
 0x660   : > { %2701 = vrsqrt.f32 %v1718_v9  ;;  %v1703_v56 = vmul.f32 0.0078125, %v1674_v36 }
 0x662   : > { %v1719_v23 = vadd.f32 1e-05, %v1703_v56 }
 0x663   : > { %v1676_v41 = vpop.xlane.xlu1 %1675 }
 0x664   : > { %2703 = vrsqrt.f32 %v1719_v23  ;;  %v1704_v10 = vmul.f32 0.0078125, %v1676_v41 }
 0x666   : > { %v1720_v7 = vadd.f32 1e-05, %v1704_v10 }
 0x667   : > { %v1678_v11 = vpop.xlane.xlu0 %1677 }
 0x668   : > { %2705 = vrsqrt.f32 %v1720_v7  ;;  %v1705_v49 = vmul.f32 0.0078125, %v1678_v11 }
 0x669   : > { %v2700_v3 = vpop.eup %2699 }
 0x66a   : > { %v1749_v6 = vmul.f32 %v2700_v3, %v3646_v20  ;;  %v1721_v32 = vadd.f32 1e-05, %v1705_v49 }
 0x66b   : > { %v1680_v0 = vpop.xlane.xlu1 %1679 }
 0x66c   : > { %2707 = vrsqrt.f32 %v1721_v32  ;;  %v1706_v46 = vmul.f32 0.0078125, %v1680_v0  ;;  %v1765_v35 = vmul.f32 %v1749_v6, %v3237_v27 }
 0x66d   : > { %v2702_v61 = vpop.eup %2701 }
 0x66e   : > { %v1750_v24 = vmul.f32 %v2702_v61, %v3652_v50  ;;  %v1722_v29 = vadd.f32 1e-05, %v1706_v46  ;;  %v1781_v63 = vadd.f32 %v1765_v35, %v3241_v38 }
 0x66f   : > { %v1682_v57 = vpop.xlane.xlu0 %1681 }
 0x670   : > { %2709 = vrsqrt.f32 %v1722_v29  ;;  %v1707_v8 = vmul.f32 0.0078125, %v1682_v57  ;;  %v1766_v15 = vmul.f32 %v1750_v24, %v3237_v27  ;;  %v1797_v59 = vmax.f32 %v1781_v63, 0.0 }
 0x671   : > { %v2704_v43 = vpop.eup %2703 }
 0x672   : > { %v1723_v44 = vadd.f32 1e-05, %v1707_v8  ;;  %v1782_v20 = vadd.f32 %v1766_v15, %v3241_v38  ;;  %v1751_v58 = vmul.f32 %v2704_v43, %v3658_v39 }
 0x673   : > { %v1684_v19 = vpop.xlane.xlu1 %1683 }
 0x674   : > { %2711 = vrsqrt.f32 %v1723_v44  ;;  %v1708_v54 = vmul.f32 0.0078125, %v1684_v19  ;;  %v1798_v28 = vmax.f32 %v1782_v20, 0.0  ;;  %v1767_v50 = vmul.f32 %v1751_v58, %v3237_v27 }
 0x675   : > { %v2706_v52 = vpop.eup %2705 }
 0x676   : > { %v1724_v26 = vadd.f32 1e-05, %v1708_v54  ;;  %v1813_v13 = vpack.c.bf16 %v1798_v28, %v1797_v59  ;;  %v1752_v55 = vmul.f32 %v2706_v52, %v3664_v48  ;;  %v1783_v31 = vadd.f32 %v1767_v50, %v3241_v38 }
 0x677   : > { %v1686_v16 = vpop.xlane.xlu0 %1685 }
 0x678   : > { %2713 = vrsqrt.f32 %v1724_v26  ;;  %v1709_v22 = vmul.f32 0.0078125, %v1686_v16  ;;  %1854 = vmatmul.mubr.bf16.vlgmr.msra.gmra.mxu1 %v1813_v13  ;;  %v1768_v39 = vmul.f32 %v1752_v55, %v3237_v27  ;;  %v1799_v10 = vmax.f32 %v1783_v31, 0.0 }
 0x679   : > { %v2708_v9 = vpop.eup %2707  ;;  %1863 = vmatprep.mubr.bf16.mxu1 %v2832_v12 }
 0x67a   : > { %v1725_v36 = vadd.f32 1e-05, %v1709_v22  ;;  %v1784_v56 = vadd.f32 %v1768_v39, %v3241_v38  ;;  %v1753_v23 = vmul.f32 %v2708_v9, %v3670_v18 }
 0x67b   : > { %v1688_v41 = vpop.xlane.xlu1 %1687 }
 0x67c   : > { %2715 = vrsqrt.f32 %v1725_v36  ;;  %v1710_v48 = vmul.f32 0.0078125, %v1688_v41  ;;  %v1800_v7 = vmax.f32 %v1784_v56, 0.0  ;;  %v1769_v11 = vmul.f32 %v1753_v23, %v3237_v27 }
 0x67d   : > { %v2710_v49 = vpop.eup %2709 }
 0x67e   : > { %v1726_v3 = vadd.f32 1e-05, %v1710_v48  ;;  %v1814_v6 = vpack.c.bf16 %v1800_v7, %v1799_v10  ;;  %v1754_v32 = vmul.f32 %v2710_v49, %v3676_v53  ;;  %v1785_v46 = vadd.f32 %v1769_v11, %v3241_v38 }
 0x67f   : > { %v1690_v0 = vpop.xlane.xlu0 %1689 }
 0x680   : > { %2717 = vrsqrt.f32 %v1726_v3  ;;  %v1711_v35 = vmul.f32 0.0078125, %v1690_v0  ;;  %1864 = vmatmul.mubr.bf16.gmra.mxu1 %v1814_v6  ;;  %v1770_v18 = vmul.f32 %v1754_v32, %v3237_v27  ;;  %v1801_v8 = vmax.f32 %v1785_v46, 0.0 }
 0x681   : > { %v2712_v61 = vpop.eup %2711  ;;  %1873 = vmatprep.mubr.bf16.mxu1 %v2832_v12 }
 0x682   : > { %v1727_v24 = vadd.f32 1e-05, %v1711_v35  ;;  %v1786_v29 = vadd.f32 %v1770_v18, %v3241_v38  ;;  %v1755_v57 = vmul.f32 %v2712_v61, %v3682_v42 }
 0x683   : > { %v1692_v63 = vpop.xlane.xlu1 %1691 }
 0x684   : > { %2719 = vrsqrt.f32 %v1727_v24  ;;  %v1712_v53 = vmul.f32 0.0078125, %v1692_v63  ;;  %v1802_v15 = vmax.f32 %v1786_v29, 0.0  ;;  %v1771_v43 = vmul.f32 %v1755_v57, %v3237_v27 }
 0x685   : > { %v2714_v44 = vpop.eup %2713 }
 0x686   : > { %v1728_v20 = vadd.f32 1e-05, %v1712_v53  ;;  %v1815_v58 = vpack.c.bf16 %v1802_v15, %v1801_v8  ;;  %v1756_v19 = vmul.f32 %v2714_v44, %v3688_v14  ;;  %v1787_v54 = vadd.f32 %v1771_v43, %v3241_v38 }
 0x687   : > { %v1694_v59 = vpop.xlane.xlu0 %1693 }
 0x688   : > { %2721 = vrsqrt.f32 %v1728_v20  ;;  %v1713_v28 = vmul.f32 0.0078125, %v1694_v59  ;;  %1874 = vmatmul.mubr.bf16.gmra.mxu1 %v1815_v58  ;;  %v1772_v42 = vmul.f32 %v1756_v19, %v3237_v27  ;;  %v1803_v16 = vmax.f32 %v1787_v54, 0.0 }
 0x689   : > { %v2716_v50 = vpop.eup %2715  ;;  %1883 = vmatprep.mubr.bf16.mxu1 %v2832_v12 }
 0x68a   : > { %v1729_v52 = vadd.f32 1e-05, %v1713_v28  ;;  %v1788_v26 = vadd.f32 %v1772_v42, %v3241_v38  ;;  %v1757_v13 = vmul.f32 %v2716_v50, %v3694_v40 }
 0x68b   : > { %v1696_v55 = vpop.xlane.xlu1 %1695 }
 0x68c   : > { %2723 = vrsqrt.f32 %v1729_v52  ;;  %v1714_v14 = vmul.f32 0.0078125, %v1696_v55  ;;  %v1804_v31 = vmax.f32 %v1788_v26, 0.0  ;;  %v1773_v22 = vmul.f32 %v1757_v13, %v3237_v27 }
 0x68d   : > { %v2718_v39 = vpop.eup %2717 }
 0x68e   : > { %v1730_v9 = vadd.f32 1e-05, %v1714_v14  ;;  %v1816_v36 = vpack.c.bf16 %v1804_v31, %v1803_v16  ;;  %v1758_v56 = vmul.f32 %v2718_v39, %v3700_v45  ;;  %v1789_v41 = vadd.f32 %v1773_v22, %v3241_v38 }
 0x68f   : > { %v1698_v23 = vpop.xlane.xlu0 %1697 }
 0x690   : > { %2725 = vrsqrt.f32 %v1730_v9  ;;  %v1715_v10 = vmul.f32 0.0078125, %v1698_v23  ;;  %1884 = vmatmul.mubr.bf16.gmra.mxu1 %v1816_v36  ;;  %v1774_v40 = vmul.f32 %v1758_v56, %v3237_v27  ;;  %v1805_v6 = vmax.f32 %v1789_v41, 0.0 }
 0x691   : > { %v2720_v48 = vpop.eup %2719  ;;  %1893 = vmatprep.mubr.bf16.mxu1 %v2832_v12 }
 0x692   : > { %v1731_v7 = vadd.f32 1e-05, %v1715_v10  ;;  %v1790_v11 = vadd.f32 %v1774_v40, %v3241_v38  ;;  %v1759_v49 = vmul.f32 %v2720_v48, %v3706_v30 }
 0x693   : > { %v1700_v3 = vpop.xlane.xlu1 %1699 }
 0x694   : > { %2727 = vrsqrt.f32 %v1731_v7  ;;  %v1716_v45 = vmul.f32 0.0078125, %v1700_v3  ;;  %v1806_v32 = vmax.f32 %v1790_v11, 0.0  ;;  %v1775_v0 = vmul.f32 %v1759_v49, %v3237_v27 }
 0x695   : > { %v2722_v46 = vpop.eup %2721 }
 0x696   : > { %v1732_v35 = vadd.f32 1e-05, %v1716_v45  ;;  %v1817_v18 = vpack.c.bf16 %v1806_v32, %v1805_v6  ;;  %v1760_v61 = vmul.f32 %v2722_v46, %v3712_v33  ;;  %v1791_v29 = vadd.f32 %v1775_v0, %v3241_v38 }
 0x698   : > { %2729 = vrsqrt.f32 %v1732_v35  ;;  %1894 = vmatmul.mubr.bf16.gmra.mxu1 %v1817_v18  ;;  %v1776_v24 = vmul.f32 %v1760_v61, %v3237_v27  ;;  %v1807_v8 = vmax.f32 %v1791_v29, 0.0 }
 0x699   : > { %v2724_v57 = vpop.eup %2723  ;;  %1903 = vmatprep.mubr.bf16.mxu1 %v2832_v12 }
 0x69a   : > { %v1792_v30 = vadd.f32 %v1776_v24, %v3241_v38  ;;  %v1761_v63 = vmul.f32 %v2724_v57, %v3718_v60 }
 0x69c   : > { %v1808_v53 = vmax.f32 %v1792_v30, 0.0  ;;  %v1777_v15 = vmul.f32 %v1761_v63, %v3237_v27 }
 0x69d   : > { %v2726_v43 = vpop.eup %2725 }
 0x69e   : > { %v1818_v44 = vpack.c.bf16 %v1808_v53, %v1807_v8  ;;  %v1762_v33 = vmul.f32 %v2726_v43, %v3724_v62  ;;  %v1793_v58 = vadd.f32 %v1777_v15, %v3241_v38 }
 0x6a0   : > { %1904 = vmatmul.mubr.bf16.gmra.mxu1 %v1818_v44  ;;  %v1778_v20 = vmul.f32 %v1762_v33, %v3237_v27  ;;  %v1809_v54 = vmax.f32 %v1793_v58, 0.0 }
 0x6a1   : > { %v2728_v19 = vpop.eup %2727  ;;  %1913 = vmatprep.mubr.bf16.mxu1 %v2832_v12 }
 0x6a2   : > { %v1794_v59 = vadd.f32 %v1778_v20, %v3241_v38  ;;  %v1763_v60 = vmul.f32 %v2728_v19, %v3730_v2 }
 0x6a4   : > { %v1810_v28 = vmax.f32 %v1794_v59, 0.0  ;;  %v1779_v42 = vmul.f32 %v1763_v60, %v3237_v27 }
 0x6a5   : > { %v2730_v50 = vpop.eup %2729 }
 0x6a6   : > { %v1819_v52 = vpack.c.bf16 %v1810_v28, %v1809_v54  ;;  %v1764_v62 = vmul.f32 %v2730_v50, %v3736_v17  ;;  %v1795_v13 = vadd.f32 %v1779_v42, %v3241_v38 }
 0x6a8   : > { %1914 = vmatmul.mubr.bf16.gmra.mxu1 %v1819_v52  ;;  %v1780_v26 = vmul.f32 %v1764_v62, %v3237_v27  ;;  %v1811_v16 = vmax.f32 %v1795_v13, 0.0 }
 0x6a9   : > { %1923 = vmatprep.mubr.bf16.mxu1 %v2832_v12 }
 0x6aa   : > { %v1796_v55 = vadd.f32 %v1780_v26, %v3241_v38 }
 0x6ac   : > { %v1812_v14 = vmax.f32 %v1796_v55, 0.0 }
 0x6ae   : > { %v1820_v2 = vpack.c.bf16 %v1812_v14, %v1811_v16 }
 0x6b0   : > { %1924 = vmatmul.mubr.bf16.gmra.mxu1 %v1820_v2 }
 0x738   : > { %v3795_v31 = vpop.f32.mrf.mxu1 }
 0x73a   : > { %v3797_v22 = vpop.f32.mrf.mxu1 }
 0x73c   : > { %v3799_v39 = vpop.f32.mrf.mxu1 }
 0x73e   : > { %v3801_v17 = vpop.f32.mrf.mxu1 }
 0x740   : > { %v3803_v9 = vpop.f32.mrf.mxu1 }
 0x742   : > { %v3805_v27 = vpop.f32.mrf.mxu1 }
 0x744   : > { %v3807_v36 = vpop.f32.mrf.mxu1 }
 0x746   : > { %v1871_v12 = vpop.f32.mrf.mxu1 }
 0x747   : > { %v1953_v16 = vadd.f32 %v1871_v12, %v3345_v5 }
 0x748   : > { %v3809_v38 = vpop.f32.mrf.mxu1 }
 0x74a   : > { %v1877_v56 = vpop.f32.mrf.mxu1 }
 0x74b   : > { %v1954_v14 = vadd.f32 %v1877_v56, %v3345_v5 }
 0x74c   : > { %v3811_v23 = vpop.f32.mrf.mxu1 }
 0x74e   : > { %v1881_v41 = vpop.f32.mrf.mxu1 }
 0x74f   : > { %v1955_v62 = vadd.f32 %v1881_v41, %v3345_v5  ;;  %v1952_v41 = vadd.f32 %v3805_v27, %v3345_v5 }
 0x750   : > { %v3813_v10 = vpop.f32.mrf.mxu1 }
 0x751   : > { %v1971_v2 = vmul.f32 0.0078125, %v1955_v62 }
 0x752   : > { %v1887_v40 = vpop.f32.mrf.mxu1 }
 0x753   : > { %v1956_v26 = vadd.f32 %v1887_v40, %v3345_v5  ;;  %v1970_v40 = vmul.f32 0.0078125, %v1954_v14 }
 0x754   : > { %v3815_v48 = vpop.f32.mrf.mxu1 }
 0x756   : > { %v1891_v7 = vpop.f32.mrf.mxu1 }
 0x757   : > { %v1957_v28 = vadd.f32 %v1891_v7, %v3345_v5  ;;  %v1972_v7 = vmul.f32 0.0078125, %v1956_v26 }
 0x758   : > { %v3817_v11 = vpop.f32.mrf.mxu1 }
 0x759   : > { %v1973_v13 = vmul.f32 0.0078125, %v1957_v28 }
 0x75a   : > { %v1897_v49 = vpop.f32.mrf.mxu1 }
 0x75b   : > { %v1958_v42 = vadd.f32 %v1897_v49, %v3345_v5  ;;  %v1951_v49 = vadd.f32 %v3801_v17, %v3345_v5 }
 0x75c   : > { %v3819_v3 = vpop.f32.mrf.mxu1 }
 0x75d   : > { %v1974_v55 = vmul.f32 0.0078125, %v1958_v42  ;;  %v1967_v12 = vmul.f32 0.0078125, %v1951_v49 }
 0x75e   : > { %v1901_v6 = vpop.f32.mrf.mxu1 }
 0x75f   : > { %v1959_v19 = vadd.f32 %v1901_v6, %v3345_v5  ;;  %v1969_v6 = vmul.f32 0.0078125, %v1953_v16 }
 0x760   : > { %v3821_v45 = vpop.f32.mrf.mxu1 }
 0x761   : > { %v1975_v50 = vmul.f32 0.0078125, %v1959_v19 }
 0x762   : > { %v1907_v32 = vpop.f32.mrf.mxu1 }
 0x763   : > { %v1960_v59 = vadd.f32 %v1907_v32, %v3345_v5  ;;  %v1950_v32 = vadd.f32 %v3797_v22, %v3345_v5 }
 0x764   : > { %v3823_v0 = vpop.f32.mrf.mxu1 }
 0x765   : > { %v1976_v52 = vmul.f32 0.0078125, %v1960_v59  ;;  %v1966_v56 = vmul.f32 0.0078125, %v1950_v32 }
 0x766   : > { %v1911_v46 = vpop.f32.mrf.mxu1 }
 0x767   : > { %v1961_v44 = vadd.f32 %v1911_v46, %v3345_v5  ;;  %v1968_v46 = vmul.f32 0.0078125, %v1952_v41 }
 0x768   : > { %v3825_v35 = vpop.f32.mrf.mxu1 }
 0x769   : > { %v1977_v60 = vmul.f32 0.0078125, %v1961_v44 }
 0x76a   : > { %v1917_v18 = vpop.f32.mrf.mxu1 }
 0x76b   : > { %v1962_v33 = vadd.f32 %v1917_v18, %v3345_v5 }
 0x76c   : > { %v1919_v61 = vpop.f32.mrf.mxu1 }
 0x76d   : > { %v1978_v54 = vmul.f32 0.0078125, %v1962_v33  ;;  %v1947_v27 = vadd.f32 %v1919_v61, %v3373_v47 }
 0x76e   : > { %v1921_v24 = vpop.f32.mrf.mxu1 }
 0x76f   : > { %v1963_v8 = vadd.f32 %v1921_v24, %v3345_v5 }
 0x770   : > { %v1925_v29 = vpop.f32.mrf.mxu1 }
 0x771   : > { %v1979_v20 = vmul.f32 0.0078125, %v1963_v8  ;;  %v1948_v18 = vadd.f32 %v1925_v29, %v3373_v47  ;;  %v1945_v29 = vadd.f32 %v3823_v0, %v3373_v47  ;;  %v1943_v0 = vadd.f32 %v3819_v3, %v3373_v47 }
 0x772   : > { %v1927_v57 = vpop.f32.mrf.mxu1  ;;  %v1941_v3 = vadd.f32 %v3815_v48, %v3373_v47  ;;  %v1939_v48 = vadd.f32 %v3811_v23, %v3373_v47  ;;  %v1937_v23 = vadd.f32 %v3807_v36, %v3373_v47  ;;  %v1935_v36 = vadd.f32 %v3799_v39, %v3373_v47 }
 0x773   : > { %v1964_v30 = vadd.f32 %v1927_v57, %v3345_v5  ;;  %v1934_v39 = vadd.f32 %v3795_v31, %v3373_v47 }
 0x774   : > { %v1929_v63 = vpop.f32.mrf.mxu1 }
 0x775   : > { %v1980_v53 = vmul.f32 0.0078125, %v1964_v30  ;;  %v1949_v57 = vadd.f32 %v1929_v63, %v3373_v47 }
 0x776   : > { %v1931_v15 = vpop.f32.mrf.mxu1 }
 0x777   : > { %v1965_v43 = vadd.f32 %v1931_v15, %v3345_v5  ;;  %2054 = vperm.xlu1 %2602, %v1980_v53   ;;  %v1946_v15 = vadd.f32 %v3825_v35, %v3373_v47  ;;  %v1944_v35 = vadd.f32 %v3821_v45, %v3373_v47  ;;  %v1942_v45 = vadd.f32 %v3817_v11, %v3373_v47 }
 0x778   : > { %v1940_v11 = vadd.f32 %v3813_v10, %v3373_v47  ;;  %v1938_v10 = vadd.f32 %v3809_v38, %v3373_v47  ;;  %v1936_v38 = vadd.f32 %v3803_v9, %v3373_v47 }
 0x779   : > { %v1981_v58 = vmul.f32 0.0078125, %v1965_v43 }
 0x77b   : > { %2049 = vperm.xlu1 %2602, %v1979_v20   ;;  %2059 = vperm.xlu0 %2601, %v1981_v58  }
 0x77f   : > { %2039 = vperm.xlu1 %2602, %v1977_v60   ;;  %2044 = vperm.xlu0 %2601, %v1978_v54  }
 0x783   : > { %2029 = vperm.xlu1 %2602, %v1975_v50   ;;  %2034 = vperm.xlu0 %2601, %v1976_v52  }
 0x787   : > { %2019 = vperm.xlu1 %2602, %v1973_v13   ;;  %2024 = vperm.xlu0 %2601, %v1974_v55  }
 0x78b   : > { %2009 = vperm.xlu1 %2602, %v1971_v2   ;;  %2014 = vperm.xlu0 %2601, %v1972_v7  }
 0x78f   : > { %1999 = vperm.xlu1 %2602, %v1969_v6   ;;  %2004 = vperm.xlu0 %2601, %v1970_v40  }
 0x793   : > { %1989 = vperm.xlu1 %2602, %v1967_v12   ;;  %1994 = vperm.xlu0 %2601, %v1968_v46  }
 0x797   : > { %1984 = vperm.xlu0 %2601, %v1966_v56  }
 0x7f2   : > { %v2055_v24 = vpop.permute.xlu1 %2054 }
 0x7f3   : > { %v3847_v17 = vsub.f32 %v1948_v18, %v2055_v24 }
 0x7f5   : > { %v2092_v30 = vmul.f32 %v3847_v17, %v3847_v17 }
 0x7f6   : > { %v2050_v8 = vpop.permute.xlu1 %2049  ;;  %v2060_v5 = vpop.permute.xlu0 %2059 }
 0x7f7   : > { %v3853_v22 = vsub.f32 %v1947_v27, %v2050_v8  ;;  %v3855_v53 = vsub.f32 %v1949_v57, %v2060_v5  ;;  %2122 = vadd.xlane.f32.xlu0 %v2092_v30 }
 0x7f9   : > { %v2091_v61 = vmul.f32 %v3853_v22, %v3853_v22  ;;  %v2093_v63 = vmul.f32 %v3855_v53, %v3855_v53 }
 0x7fa   : > { %v2040_v43 = vpop.permute.xlu1 %2039  ;;  %v2045_v44 = vpop.permute.xlu0 %2044 }
 0x7fb   : > { %v3865_v33 = vsub.f32 %v1945_v29, %v2040_v43  ;;  %v3867_v20 = vsub.f32 %v1946_v15, %v2045_v44  ;;  %2120 = vadd.xlane.f32.xlu0 %v2091_v61  ;;  %2124 = vadd.xlane.f32.xlu1 %v2093_v63  ;;  %v2768_v61 = vld [vmem:[%s4076_s3] sm:$0xff] }
 0x7fd   : > { %v2089_v58 = vmul.f32 %v3865_v33, %v3865_v33  ;;  %v2090_v19 = vmul.f32 %v3867_v20, %v3867_v20 }
 0x7fe   : > { %v2030_v59 = vpop.permute.xlu1 %2029  ;;  %v2035_v60 = vpop.permute.xlu0 %2034 }
 0x7ff   : > { %v3877_v54 = vsub.f32 %v1943_v0, %v2030_v59  ;;  %v3879_v28 = vsub.f32 %v1944_v35, %v2035_v60  ;;  %2116 = vadd.xlane.f32.xlu0 %v2089_v58  ;;  %2118 = vadd.xlane.f32.xlu1 %v2090_v19 }
 0x801   : > { %v2087_v42 = vmul.f32 %v3877_v54, %v3877_v54  ;;  %v2088_v50 = vmul.f32 %v3879_v28, %v3879_v28 }
 0x802   : > { %v2020_v52 = vpop.permute.xlu1 %2019  ;;  %v2025_v62 = vpop.permute.xlu0 %2024 }
 0x803   : > { %v3889_v26 = vsub.f32 %v1941_v3, %v2020_v52  ;;  %v3891_v13 = vsub.f32 %v1942_v45, %v2025_v62  ;;  %2112 = vadd.xlane.f32.xlu0 %v2087_v42  ;;  %2114 = vadd.xlane.f32.xlu1 %v2088_v50 }
 0x805   : > { %v2085_v55 = vmul.f32 %v3889_v26, %v3889_v26  ;;  %v2086_v16 = vmul.f32 %v3891_v13, %v3891_v13 }
 0x806   : > { %v2010_v14 = vpop.permute.xlu1 %2009  ;;  %v2015_v2 = vpop.permute.xlu0 %2014 }
 0x807   : > { %v3901_v7 = vsub.f32 %v1939_v48, %v2010_v14  ;;  %v3903_v49 = vsub.f32 %v1940_v11, %v2015_v2  ;;  %2108 = vadd.xlane.f32.xlu0 %v2085_v55  ;;  %2110 = vadd.xlane.f32.xlu1 %v2086_v16 }
 0x809   : > { %v2083_v41 = vmul.f32 %v3901_v7, %v3901_v7  ;;  %v2084_v6 = vmul.f32 %v3903_v49, %v3903_v49 }
 0x80a   : > { %v2000_v40 = vpop.permute.xlu1 %1999  ;;  %v2005_v32 = vpop.permute.xlu0 %2004 }
 0x80b   : > { %v3913_v12 = vsub.f32 %v1937_v23, %v2000_v40  ;;  %v3915_v46 = vsub.f32 %v1938_v10, %v2005_v32  ;;  %2104 = vadd.xlane.f32.xlu0 %v2083_v41  ;;  %2106 = vadd.xlane.f32.xlu1 %v2084_v6 }
 0x80d   : > { %v2081_v56 = vmul.f32 %v3913_v12, %v3913_v12  ;;  %v2082_v18 = vmul.f32 %v3915_v46, %v3915_v46 }
 0x80e   : > { %v1990_v24 = vpop.permute.xlu1 %1989  ;;  %v1995_v27 = vpop.permute.xlu0 %1994 }
 0x80f   : > { %v3925_v57 = vsub.f32 %v1935_v36, %v1990_v24  ;;  %v3927_v30 = vsub.f32 %v1936_v38, %v1995_v27  ;;  %2100 = vadd.xlane.f32.xlu0 %v2081_v56  ;;  %2102 = vadd.xlane.f32.xlu1 %v2082_v18 }
 0x811   : > { %v2079_v9 = vmul.f32 %v3925_v57, %v3925_v57  ;;  %v2080_v8 = vmul.f32 %v3927_v30, %v3927_v30 }
 0x812   : > { %v1985_v5 = vpop.permute.xlu0 %1984 }
 0x813   : > { %v3935_v29 = vsub.f32 %v1934_v39, %v1985_v5  ;;  %2096 = vadd.xlane.f32.xlu0 %v2079_v9  ;;  %2098 = vadd.xlane.f32.xlu1 %v2080_v8 }
 0x815   : > { %v2078_v15 = vmul.f32 %v3935_v29, %v3935_v29 }
 0x817   : > { %2094 = vadd.xlane.f32.xlu1 %v2078_v15 }
 0x829   : > { %1266 = vperm.xlu0 %2601, %v2768_v61  }
 0x880   : > { %v2123_v47 = vpop.xlane.xlu0 %2122 }
 0x881   : > { %v2140_v31 = vmul.f32 0.0078125, %v2123_v47 }
 0x883   : > { %v2156_v63 = vadd.f32 1e-05, %v2140_v31 }
 0x884   : > { %v2125_v43 = vpop.xlane.xlu1 %2124  ;;  %v2121_v44 = vpop.xlane.xlu0 %2120 }
 0x885   : > { %2731 = vrsqrt.f32 %v2156_v63  ;;  %v2141_v0 = vmul.f32 0.0078125, %v2125_v43  ;;  %v2139_v35 = vmul.f32 0.0078125, %v2121_v44 }
 0x887   : > { %v2157_v58 = vadd.f32 1e-05, %v2141_v0  ;;  %v2155_v19 = vadd.f32 1e-05, %v2139_v35 }
 0x888   : > { %v2119_v59 = vpop.xlane.xlu1 %2118  ;;  %v2117_v60 = vpop.xlane.xlu0 %2116 }
 0x889   : > { %2733 = vrsqrt.f32 %v2157_v58  ;;  %v2138_v3 = vmul.f32 0.0078125, %v2119_v59  ;;  %v2137_v45 = vmul.f32 0.0078125, %v2117_v60 }
 0x88a   : > { %2735 = vrsqrt.f32 %v2155_v19 }
 0x88b   : > { %v2154_v42 = vadd.f32 1e-05, %v2138_v3  ;;  %v2153_v62 = vadd.f32 1e-05, %v2137_v45 }
 0x88c   : > { %v2115_v50 = vpop.xlane.xlu1 %2114  ;;  %v2113_v52 = vpop.xlane.xlu0 %2112 }
 0x88d   : > { %2737 = vrsqrt.f32 %v2154_v42  ;;  %v2136_v48 = vmul.f32 0.0078125, %v2115_v50  ;;  %v2135_v16 = vmul.f32 0.0078125, %v2113_v52 }
 0x88e   : > { %2739 = vrsqrt.f32 %v2153_v62 }
 0x88f   : > { %v2152_v55 = vadd.f32 1e-05, %v2136_v48  ;;  %v2151_v10 = vadd.f32 1e-05, %v2135_v16 }
 0x890   : > { %v2109_v11 = vpop.xlane.xlu0 %2108  ;;  %v2111_v2 = vpop.xlane.xlu1 %2110 }
 0x891   : > { %2741 = vrsqrt.f32 %v2152_v55  ;;  %v2134_v41 = vmul.f32 0.0078125, %v2111_v2  ;;  %v2133_v38 = vmul.f32 0.0078125, %v2109_v11 }
 0x892   : > { %v2732_v14 = vpop.eup %2731  ;;  %2743 = vrsqrt.f32 %v2151_v10 }
 0x893   : > { %v2188_v6 = vmul.f32 %v2732_v14, %v3847_v17  ;;  %v2150_v18 = vadd.f32 1e-05, %v2134_v41  ;;  %v2149_v17 = vadd.f32 1e-05, %v2133_v38 }
 0x894   : > { %v2105_v23 = vpop.xlane.xlu0 %2104  ;;  %v2107_v24 = vpop.xlane.xlu1 %2106 }
 0x895   : > { %v2204_v39 = vmul.f32 %v2188_v6, %v3474_v51  ;;  %v2132_v15 = vmul.f32 0.0078125, %v2107_v24  ;;  %2745 = vrsqrt.f32 %v2150_v18  ;;  %v2131_v43 = vmul.f32 0.0078125, %v2105_v23 }
 0x896   : > { %v2734_v40 = vpop.eup %2733  ;;  %2747 = vrsqrt.f32 %v2149_v17 }
 0x897   : > { %v2736_v32 = vpop.eup %2735  ;;  %v2189_v36 = vmul.f32 %v2734_v40, %v3855_v53  ;;  %v2148_v63 = vadd.f32 1e-05, %v2132_v15 }
 0x898   : > { %v2187_v56 = vmul.f32 %v2736_v32, %v3853_v22  ;;  %v2101_v8 = vpop.xlane.xlu0 %2100  ;;  %v2220_v22 = vadd.f32 %v2204_v39, %v3479_v21  ;;  %v2103_v35 = vpop.xlane.xlu1 %2102 }
 0x899   : > { %v2205_v27 = vmul.f32 %v2189_v36, %v3474_v51  ;;  %2749 = vrsqrt.f32 %v2148_v63  ;;  %v2130_v3 = vmul.f32 0.0078125, %v2103_v35  ;;  %v2129_v14 = vmul.f32 0.0078125, %v2101_v8 }
 0x89a   : > { %v2738_v9 = vpop.eup %2737  ;;  %v2203_v61 = vmul.f32 %v2187_v56, %v3474_v51  ;;  %v2236_v58 = vmax.f32 %v2220_v22, 0.0 }
 0x89b   : > { %v2221_v5 = vadd.f32 %v2205_v27, %v3479_v21  ;;  %v2186_v47 = vmul.f32 %v2738_v9, %v3867_v20  ;;  %v2740_v31 = vpop.eup %2739  ;;  %v2147_v20 = vadd.f32 1e-05, %v2131_v43  ;;  %v2146_v16 = vadd.f32 1e-05, %v2130_v3 }
 0x89c   : > { %v2097_v44 = vpop.xlane.xlu0 %2096  ;;  %v2219_v0 = vadd.f32 %v2203_v61, %v3479_v21  ;;  %v2185_v59 = vmul.f32 %v2740_v31, %v3865_v33  ;;  %v2099_v2 = vpop.xlane.xlu1 %2098  ;;  %v2145_v41 = vadd.f32 1e-05, %v2129_v14 }
 0x89d   : > { %v2237_v53 = vmax.f32 %v2221_v5, 0.0  ;;  %v2202_v19 = vmul.f32 %v2186_v47, %v3474_v51  ;;  %2751 = vrsqrt.f32 %v2147_v20  ;;  %v2128_v6 = vmul.f32 0.0078125, %v2099_v2 }
 0x89e   : > { %v2742_v60 = vpop.eup %2741  ;;  %v2235_v42 = vmax.f32 %v2219_v0, 0.0  ;;  %v2201_v62 = vmul.f32 %v2185_v59, %v3474_v51  ;;  %2753 = vrsqrt.f32 %v2146_v16  ;;  %v2127_v18 = vmul.f32 0.0078125, %v2097_v44 }
 0x89f   : > { %2522 = vmatpush3.xpose.msra.mxu0 %v2237_v53  ;;  %v2218_v52 = vadd.f32 %v2202_v19, %v3479_v21  ;;  %v2184_v33 = vmul.f32 %v2742_v60, %v3879_v28  ;;  %v2744_v48 = vpop.eup %2743  ;;  %2755 = vrsqrt.f32 %v2145_v41  ;;  %v2144_v56 = vadd.f32 1e-05, %v2128_v6 }
 0x8a0   : > { %2523 = vmatprep.subr.mxu0 %v2835_v4  ;;  %v2217_v28 = vadd.f32 %v2201_v62, %v3479_v21  ;;  %v2183_v1 = vmul.f32 %v2744_v48, %v3877_v54  ;;  %v2095_v27 = vpop.xlane.xlu1 %2094  ;;  %v2143_v17 = vadd.f32 1e-05, %v2127_v18 }
 0x8a1   : > { %v2234_v23 = vmax.f32 %v2218_v52, 0.0  ;;  %v2200_v10 = vmul.f32 %v2184_v33, %v3474_v51  ;;  %2757 = vrsqrt.f32 %v2144_v56 }
 0x8a2   : > { %v2233_v40 = vmax.f32 %v2217_v28, 0.0  ;;  %v2199_v36 = vmul.f32 %v2183_v1, %v3474_v51  ;;  %2759 = vrsqrt.f32 %v2143_v17 }
 0x8a3   : > { %2524 = vmatpush3.xpose.msra.mxu0 %v2236_v58  ;;  %v2216_v32 = vadd.f32 %v2200_v10, %v3479_v21 }
 0x8a4   : > { %v3958_v45 = vpop.permute.xlu0 %1266  ;;  %2525 = vmatprep.subr.mxu0 %v2835_v4  ;;  %v2215_v9 = vadd.f32 %v2199_v36, %v3479_v21 }
 0x8a5   : > { %v1270_v50 = vrot.slane %v3958_v45, 7  ;;  %v2232_v39 = vmax.f32 %v2216_v32, 0.0 }
 0x8a6   : > { %v2231_v61 = vmax.f32 %v2215_v9, 0.0 }
 0x8a7   : > { %v1339_v55 = vadd.f32 %v3594_v25, %v1270_v50  ;;  %2526 = vmatpush3.xpose.msra.mxu0 %v2235_v42  ;;  %v2746_v25 = vpop.eup %2745 }
 0x8a8   : > { %2527 = vmatprep.subr.mxu0 %v2835_v4  ;;  %v2182_v54 = vmul.f32 %v2746_v25, %v3891_v13  ;;  %v2748_v38 = vpop.eup %2747  ;;  %v2126_v13 = vmul.f32 0.0078125, %v2095_v27 }
 0x8a9   : > { %1346 = vst.msk [vmem:[%s3977_s23] sm:$0x1] %vm3966_vm4, %v1339_v55  ;;  %v2750_v24 = vpop.eup %2749  ;;  %v2181_v5 = vmul.f32 %v2748_v38, %v3889_v26 }
 0x8aa   : > { %v2198_v8 = vmul.f32 %v2182_v54, %v3474_v51  ;;  %v2752_v15 = vpop.eup %2751  ;;  %v2180_v47 = vmul.f32 %v2750_v24, %v3903_v49  ;;  %v2142_v31 = vadd.f32 1e-05, %v2126_v13 }
 0x8ab   : > { %2528 = vmatpush3.xpose.msra.mxu0 %v2234_v23  ;;  %v2197_v22 = vmul.f32 %v2181_v5, %v3474_v51  ;;  %v2754_v26 = vpop.eup %2753  ;;  %v2179_v0 = vmul.f32 %v2752_v15, %v3901_v7 }
 0x8ac   : > { %2529 = vmatprep.subr.mxu0 %v2835_v4  ;;  %v2214_v53 = vadd.f32 %v2198_v8, %v3479_v21  ;;  %v2196_v44 = vmul.f32 %v2180_v47, %v3474_v51  ;;  %2761 = vrsqrt.f32 %v2142_v31  ;;  %v2756_v35 = vpop.eup %2755  ;;  %v2178_v59 = vmul.f32 %v2754_v26, %v3915_v46 }
 0x8ad   : > { %v2213_v43 = vadd.f32 %v2197_v22, %v3479_v21  ;;  %v2195_v19 = vmul.f32 %v2179_v0, %v3474_v51  ;;  %v2177_v42 = vmul.f32 %v2756_v35, %v3913_v12 }
 0x8ae   : > { %v2230_v63 = vmax.f32 %v2214_v53, 0.0  ;;  %v2212_v49 = vadd.f32 %v2196_v44, %v3479_v21  ;;  %v2758_v60 = vpop.eup %2757  ;;  %v2194_v7 = vmul.f32 %v2178_v59, %v3474_v51 }
 0x8af   : > { %2530 = vmatpush3.xpose.msra.mxu0 %v2233_v40  ;;  %v2229_v58 = vmax.f32 %v2213_v43, 0.0  ;;  %v2211_v3 = vadd.f32 %v2195_v19, %v3479_v21  ;;  %v2760_v52 = vpop.eup %2759  ;;  %v2193_v46 = vmul.f32 %v2177_v42, %v3474_v51  ;;  %v2176_v48 = vmul.f32 %v2758_v60, %v3927_v30 }
 0x8b0   : > { %2531 = vmatprep.subr.mxu0 %v2835_v4  ;;  %v2228_v20 = vmax.f32 %v2212_v49, 0.0  ;;  %v2210_v33 = vadd.f32 %v2194_v7, %v3479_v21  ;;  %v2175_v2 = vmul.f32 %v2760_v52, %v3925_v57 }
 0x8b1   : > { %v2227_v62 = vmax.f32 %v2211_v3, 0.0  ;;  %v2209_v14 = vadd.f32 %v2193_v46, %v3479_v21  ;;  %v2192_v12 = vmul.f32 %v2176_v48, %v3474_v51 }
 0x8b2   : > { %v2226_v16 = vmax.f32 %v2210_v33, 0.0  ;;  %v2191_v10 = vmul.f32 %v2175_v2, %v3474_v51 }
 0x8b3   : > { %2532 = vmatpush3.xpose.msra.mxu0 %v2232_v39  ;;  %v2225_v23 = vmax.f32 %v2209_v14, 0.0  ;;  %v2208_v28 = vadd.f32 %v2192_v12, %v3479_v21 }
 0x8b4   : > { %2533 = vmatprep.subr.mxu0 %v2835_v4  ;;  %v2207_v25 = vadd.f32 %v2191_v10, %v3479_v21 }
 0x8b5   : > { %v2224_v1 = vmax.f32 %v2208_v28, 0.0 }
 0x8b6   : > { %v2223_v41 = vmax.f32 %v2207_v25, 0.0 }
 0x8b7   : > { %2534 = vmatpush3.xpose.msra.mxu0 %v2231_v61 }
 0x8b8   : > { %2535 = vmatprep.subr.mxu0 %v2835_v4 }
 0x8b9   : > { %v2762_v55 = vpop.eup %2761 }
 0x8ba   : > { %v2174_v30 = vmul.f32 %v2762_v55, %v3935_v29 }
 0x8bb   : > { %2536 = vmatpush3.xpose.msra.mxu0 %v2230_v63 }
 0x8bc   : > { %2537 = vmatprep.subr.mxu0 %v2835_v4  ;;  %v2190_v57 = vmul.f32 %v2174_v30, %v3474_v51 }
 0x8be   : > { %v2206_v6 = vadd.f32 %v2190_v57, %v3479_v21 }
 0x8bf   : > { %2538 = vmatpush3.xpose.msra.mxu0 %v2229_v58 }
 0x8c0   : > { %2539 = vmatprep.subr.mxu0 %v2835_v4  ;;  %v2222_v29 = vmax.f32 %v2206_v6, 0.0 }
 0x8c3   : > { %2540 = vmatpush3.xpose.msra.mxu0 %v2228_v20 }
 0x8c4   : > { %2541 = vmatprep.subr.mxu0 %v2835_v4 }
 0x8c7   : > { %2542 = vmatpush3.xpose.msra.mxu0 %v2227_v62 }
 0x8c8   : > { %2543 = vmatprep.subr.mxu0 %v2835_v4 }
 0x8cb   : > { %2544 = vmatpush3.xpose.msra.mxu0 %v2226_v16 }
 0x8cc   : > { %2545 = vmatprep.subr.mxu0 %v2835_v4 }
 0x8cf   : > { %2546 = vmatpush3.xpose.msra.mxu0 %v2225_v23 }
 0x8d0   : > { %2547 = vmatprep.subr.mxu0 %v2835_v4 }
 0x8d3   : > { %2548 = vmatpush3.xpose.msra.mxu0 %v2224_v1 }
 0x8d4   : > { %2549 = vmatprep.subr.mxu0 %v2835_v4 }
 0x8d7   : > { %2550 = vmatpush3.xpose.msra.mxu0 %v2223_v41 }
 0x8d8   : > { %2551 = vmatprep.subr.mxu0 %v2835_v4 }
 0x8db   : > { %2552 = vmatpush3.xpose.msra.mxu0 %v2222_v29 }
 0x8de   : > { %2554 = vmatmul.mubr.f32.vlgmr.msra.gmra.mxu0 %v1268_v34 }
 0x99e   : > { %v2304_v40 = vpop.f32.mrf.mxu0 }
 0x99f   : > { %v2305_v51 = vadd.f32 %v2304_v40, %v1270_v50 }
 0x9a0   : > { %v2555_v21 = vpop.f32.mrf.mxu0 }
 0x9a1   : > { %2445 = vst.msk [vmem:[%s3977_s23 + $0x1] sm:$0x1] %vm3966_vm4, %v2305_v51 }
 0x9a2   : > { %2782 = shalt.err (!%p2779_p3)
}
 0x9a3   : > { %s2783_s5 = scalar_lea.hbm %s4033_s30, 32  ;;  %s2787_s13 = scalar_lea.hbm %s4077_s4, 64 }
 0x9a4   : > { %p2784_p4 = scmp.ne.s32.totalorder %s4033_s30, %s2783_s5  ;;  %p2788_p9 = scmp.lt.s32.totalorder %s4033_s30, %s4077_s4 }
 0x9a5   : > { %p2789_p10 = scmp.lt.s32.totalorder %s2787_s13, %s2783_s5 }
 0x9a6   : > { %p2785_p7 = pnand %p2784_p4, %p2898_p5 }
 0x9a7   : > { %p2790_p11 = por %p2789_p10, %p2788_p9 }
 0x9a8   : > { %p2786_p8 = pneg %p2785_p7 }
 0x9aa   : > { %p2791_p12 = pnand %p2790_p11, %p2786_p8 }
 0x9ac   : > { %2794 = shalt.err (!%p2791_p12)
}
 0x9ad   : > { %2556 = dma.vmem_to_hbm [thread:$0]  (%p2898_p5), %s2326_s27, 32, %s4033_s30, %s2311_s6  }
 0x9ae PF: > { %p2562_p13 = scmp.ge.s32.totalorder %s2829_s18, 2  ;;  %s2337_s19 = sand.u32 1, %s2817_s15  }
 0x9af   : > { %s2338_s22 = scalar_lea.sflag [#allocation3], %s2337_s19 }
 0x9b0   : > { %p2559_p0 = pnand %p2562_p13, %p2902_p6 }
 0x9b2   : > { %p2560_p1 = pneg %p2559_p0 }
 0x9b4   : > { %2812 = dma.done.wait (%p2560_p1), %s2338_s22, 32  }
 0x9b5   : > { %2814 = vsyncadd (%p2560_p1), %s2338_s22, 4294967264  ;;  %p14_p2 = scmp.ge.s32.totalorder %s2886_s21, 4   ;;  %s4082_s15 = smov %s2821_s16 }
 0x9b6   : > { %s4083_s16 = smov %s2825_s17  ;;  %s4084_s17 = smov %s2896_s24 }
 0x9b7   : > { %s4085_s18 = smov %s2886_s21  ;;  %16 = sbr.rel (!%p14_p2) target bundleno = 3 (0x3), region = 73 }
 0x9bc   :  { %2343 = vsyncpa [#allocation3], 1 }
 0x9bd   :  { %2345 = vsyncpa [#allocation3 + $0x1], 1 }

</bundles_post_ra>
